<compile_context>
chip_gen: v6e
topology: v6e:2x2x1
jax: 0.10.0
libtpu: 0.0.40
codegen_flags: <defaults>
</compile_context>

<pallas_src>
import jax
import jax.numpy as jnp
from jax.experimental import pallas as pl
from jax.experimental.pallas import tpu as pltpu


def _round_up(n, m):
    return ((n + m - 1) // m) * m


def _cond_multi_ae_kernel(x_ref, w1_ref, b1_ref, w2_ref, b2_ref,
                          w3_ref, b3_ref, w4_ref, b4_ref, o_ref):
    """One grid step == one batch tile; all T autoencoders applied inside."""
    x = x_ref[...]                                   # [TB, Dp] f32
    T, H1p, _ = w2_ref.shape
    xb = x.astype(jnp.bfloat16)

    # ---- layer 1, batched across all targets (x is shared): one wide matmul
    h1_all = jnp.maximum(
        jnp.dot(xb, w1_ref[...], preferred_element_type=jnp.float32)
        + b1_ref[...], 0.0)                          # [TB, T*H1p] f32

    best_err = None
    # T is a small compile-time constant; weights stay resident in VMEM.
    for t in range(T):
        h1 = h1_all[:, t * H1p:(t + 1) * H1p].astype(jnp.bfloat16)
        z = jnp.maximum(
            jnp.dot(h1, w2_ref[t], preferred_element_type=jnp.float32)
            + b2_ref[t], 0.0).astype(jnp.bfloat16)
        h2 = jnp.maximum(
            jnp.dot(z, w3_ref[t], preferred_element_type=jnp.float32)
            + b3_ref[t], 0.0).astype(jnp.bfloat16)
        out = jax.nn.sigmoid(
            jnp.dot(h2, w4_ref[t], preferred_element_type=jnp.float32)
            + b4_ref[t])                             # [TB, Dp] f32

        # sum instead of mean: argmin unchanged, saves a B×D broadcast-mul.
        err = jnp.sum((out - x) ** 2, axis=-1, keepdims=True)   # [TB, 1]

        if t == 0:
            best_err = err
            o_ref[...] = out.astype(o_ref.dtype)
        else:
            # strict "<" keeps the FIRST minimum on ties (torch.argmin).
            mask = err < best_err
            best_err = jnp.where(mask, err, best_err)
            o_ref[...] = jnp.where(mask, out, o_ref[...]).astype(o_ref.dtype)


def conditional_multi_ae_forward(x_nchw, params):
    """Equivalent of ConditionalMultiAEMNIST.forward(x, condition_int=None)."""
    w1, b1, w2, b2, w3, b3, w4, b4 = params
    B, C, H, W = x_nchw.shape
    D = C * H * W
    T, _, H1 = w1.shape
    L = w2.shape[2]

    LANE = 128
    Dp = _round_up(D, LANE)
    H1p = _round_up(H1, LANE)
    Lp = _round_up(L, LANE)
    TILE_B = 128 if B >= 128 else _round_up(B, 8)
    Bp = _round_up(B, TILE_B)

    x_flat = x_nchw.reshape(B, D).astype(jnp.float32)
    x_p = jnp.pad(x_flat, ((0, Bp - B), (0, Dp - D)))

    def pad23(a, d1, d2):   # zero-pad the last two dims of a [T, d1, d2] stack
        return jnp.pad(a, ((0, 0), (0, d1 - a.shape[1]), (0, d2 - a.shape[2])))

    w1p = pad23(w1, Dp, H1p)
    b1p = pad23(b1, 1, H1p)
    w2p = pad23(w2, H1p, Lp)
    b2p = pad23(b2, 1, Lp)
    w3p = pad23(w3, Lp, H1p)
    b3p = pad23(b3, 1, H1p)
    w4p = pad23(w4, H1p, Dp)
    b4p = pad23(b4, 1, Dp)

    # Pack layer-1 across targets: one wide [Dp, T*H1p] matmul in the kernel.
    w1_all = w1p.transpose(1, 0, 2).reshape(Dp, T * H1p).astype(jnp.bfloat16)
    b1_all = b1p.transpose(1, 0, 2).reshape(1, T * H1p).astype(jnp.float32)
    w2q = w2p.astype(jnp.bfloat16)
    w3q = w3p.astype(jnp.bfloat16)
    w4q = w4p.astype(jnp.bfloat16)
    b2f = b2p.astype(jnp.float32)
    b3f = b3p.astype(jnp.float32)
    b4f = b4p.astype(jnp.float32)

    n_tiles = Bp // TILE_B
    const2 = lambda i: (0, 0)
    const3 = lambda i: (0, 0, 0)

    grid_spec = pltpu.PrefetchScalarGridSpec(
        num_scalar_prefetch=0,
        grid=(n_tiles,),
        in_specs=[
            pl.BlockSpec((TILE_B, Dp), lambda i: (i, 0)),     # x batch tile
            pl.BlockSpec((Dp, T * H1p), const2),              # packed w1 (resident)
            pl.BlockSpec((1, T * H1p), const2),               # packed b1
            pl.BlockSpec((T, H1p, Lp), const3),               # w2 stack (resident)
            pl.BlockSpec((T, 1, Lp), const3),                 # b2 stack
            pl.BlockSpec((T, Lp, H1p), const3),               # w3 stack
            pl.BlockSpec((T, 1, H1p), const3),                # b3 stack
            pl.BlockSpec((T, H1p, Dp), const3),               # w4 stack
            pl.BlockSpec((T, 1, Dp), const3),                 # b4 stack
        ],
        out_specs=pl.BlockSpec((TILE_B, Dp), lambda i: (i, 0)),
    )

    weight_bytes = sum(int(a.size) * a.dtype.itemsize
                       for a in (w1_all, b1_all, w2q, b2f, w3q, b3f, w4q, b4f))
    cost = pl.CostEstimate(
        flops=2 * Bp * (Dp * T * H1p + T * (H1p * Lp + Lp * H1p + H1p * Dp)),
        transcendentals=Bp * T * Dp,
        bytes_accessed=weight_bytes + int(x_p.size) * 4 + Bp * Dp * 4,
    )

    out_p = pl.pallas_call(
        _cond_multi_ae_kernel,
        out_shape=jax.ShapeDtypeStruct((Bp, Dp), jnp.float32),
        grid_spec=grid_spec,
        compiler_params=pltpu.CompilerParams(
            dimension_semantics=("parallel",),   # batch tiles are independent
        ),
        cost_estimate=cost,
    )(x_p, w1_all, b1_all, w2q, b2f, w3q, b3f, w4q, b4f)

    return out_p[:B, :D].reshape(B, C, H, W)


def init_params(key, num_targets, D, H1, L):
    """Deterministic synthetic parameters for T stacked AEMNIST modules."""
    ks = jax.random.split(key, 8)
    s = 0.05
    w1 = s * jax.random.normal(ks[0], (num_targets, D, H1), jnp.float32)
    b1 = s * jax.random.normal(ks[1], (num_targets, 1, H1), jnp.float32)
    w2 = s * jax.random.normal(ks[2], (num_targets, H1, L), jnp.float32)
    b2 = s * jax.random.normal(ks[3], (num_targets, 1, L), jnp.float32)
    w3 = s * jax.random.normal(ks[4], (num_targets, L, H1), jnp.float32)
    b3 = s * jax.random.normal(ks[5], (num_targets, 1, H1), jnp.float32)
    w4 = s * jax.random.normal(ks[6], (num_targets, H1, D), jnp.float32)
    b4 = s * jax.random.normal(ks[7], (num_targets, 1, D), jnp.float32)
    return (w1, b1, w2, b2, w3, b3, w4, b4)


def reference_forward(x_nchw, params):
    """Pure-JAX replica of the PyTorch forward (condition_int=None path).

    Uses the same bf16-operand / f32-accumulate matmuls as the kernel so the
    comparison isolates kernel-structure correctness from the storage-dtype
    tradeoff.
    """
    w1, b1, w2, b2, w3, b3, w4, b4 = params
    B, C, H, W = x_nchw.shape
    D = C * H * W
    x = x_nchw.reshape(B, D).astype(jnp.float32)
    qb = lambda a: a.astype(jnp.bfloat16)

    def one_ae(t):
        h1 = jnp.maximum(jnp.dot(qb(x), qb(w1[t]),
                                 preferred_element_type=jnp.float32) + b1[t], 0.0)
        z = jnp.maximum(jnp.dot(qb(h1), qb(w2[t]),
                                preferred_element_type=jnp.float32) + b2[t], 0.0)
        h2 = jnp.maximum(jnp.dot(qb(z), qb(w3[t]),
                                 preferred_element_type=jnp.float32) + b3[t], 0.0)
        return jax.nn.sigmoid(jnp.dot(qb(h2), qb(w4[t]),
                                      preferred_element_type=jnp.float32) + b4[t])

    outs = jnp.stack([one_ae(t) for t in range(w1.shape[0])], axis=1)   # [B,T,D]
    errors = jnp.mean((outs - x[:, None, :]) ** 2, axis=-1)             # [B,T]
    cond = jnp.argmin(errors, axis=1)                                   # [B]
    sel = outs[jnp.arange(B), cond]                                     # [B,D]
    return sel.reshape(B, C, H, W)


if __name__ == "__main__":
    # Small MNIST-like shapes: batch=4, channels=1, spatial=16x16, 3 targets.
    B, C, H, W = 4, 1, 16, 16
    D = C * H * W          # 256
    H1, L = 128, 32        # latent L=32 exercises the zero-pad-to-128 path
    T = 3

    key = jax.random.PRNGKey(0)
    k_x, k_p = jax.random.split(key)
    x = jax.random.uniform(k_x, (B, C, H, W), jnp.float32)
    params = init_params(k_p, T, D, H1, L)

    out = conditional_multi_ae_forward(x, params)
    out = jax.block_until_ready(out)

    ref = reference_forward(x, params)
    assert out.shape == (B, C, H, W)
    assert jnp.allclose(out, ref, rtol=2e-3, atol=2e-3), "mismatch vs reference"

    print("KERNEL_OK")
</pallas_src>

<mosaic_0001>
module attributes {stable_mosaic.version = 11 : i64} {
  func.func @_cond_multi_ae_kernel(%arg0: i32, %arg1: memref<8x256xf32, #tpu.memory_space<vmem>>, %arg2: memref<256x384xbf16, #tpu.memory_space<vmem>>, %arg3: memref<1x384xf32, #tpu.memory_space<vmem>>, %arg4: memref<3x128x128xbf16, #tpu.memory_space<vmem>>, %arg5: memref<3x1x128xf32, #tpu.memory_space<vmem>>, %arg6: memref<3x128x128xbf16, #tpu.memory_space<vmem>>, %arg7: memref<3x1x128xf32, #tpu.memory_space<vmem>>, %arg8: memref<3x128x256xbf16, #tpu.memory_space<vmem>>, %arg9: memref<3x1x256xf32, #tpu.memory_space<vmem>>, %arg10: memref<8x256xf32, #tpu.memory_space<vmem>>) attributes {dimension_semantics = [#tpu.dimension_semantics<parallel>], iteration_bounds = array<i64: 1>, scalar_prefetch = 0 : i64, scratch_operands = 0 : i64, tpu.core_type = #tpu.core_type<tc>, window_params = [{transform_indices = @transform_0, window_bounds = array<i64: 8, 256>}, {pipeline_mode = #tpu.pipeline_mode<synchronous>, transform_indices = @transform_1, window_bounds = array<i64: 256, 384>}, {pipeline_mode = #tpu.pipeline_mode<synchronous>, transform_indices = @transform_2, window_bounds = array<i64: 1, 384>}, {pipeline_mode = #tpu.pipeline_mode<synchronous>, transform_indices = @transform_3, window_bounds = array<i64: 3, 128, 128>}, {pipeline_mode = #tpu.pipeline_mode<synchronous>, transform_indices = @transform_4, window_bounds = array<i64: 3, 1, 128>}, {pipeline_mode = #tpu.pipeline_mode<synchronous>, transform_indices = @transform_5, window_bounds = array<i64: 3, 128, 128>}, {pipeline_mode = #tpu.pipeline_mode<synchronous>, transform_indices = @transform_6, window_bounds = array<i64: 3, 1, 128>}, {pipeline_mode = #tpu.pipeline_mode<synchronous>, transform_indices = @transform_7, window_bounds = array<i64: 3, 128, 256>}, {pipeline_mode = #tpu.pipeline_mode<synchronous>, transform_indices = @transform_8, window_bounds = array<i64: 3, 1, 256>}, {transform_indices = @transform_9, window_bounds = array<i64: 8, 256>}]} {
    %c0 = arith.constant 0 : index
    %c0_0 = arith.constant 0 : index
    %0 = vector.load %arg1[%c0, %c0_0] : memref<8x256xf32, #tpu.memory_space<vmem>>, vector<8x256xf32>
    %1 = arith.truncf %0 : vector<8x256xf32> to vector<8x256xbf16>
    %c0_1 = arith.constant 0 : index
    %c0_2 = arith.constant 0 : index
    %2 = vector.load %arg2[%c0_1, %c0_2] : memref<256x384xbf16, #tpu.memory_space<vmem>>, vector<256x384xbf16>
    %cst = arith.constant dense<0.000000e+00> : vector<8x384xf32>
    %3 = tpu.matmul %1, %2, %cst {dimension_numbers = #tpu.dot_dimension_numbers<[1], [0], [0], [1], [0, 0, 1, 1], [], []>} : vector<8x256xbf16>, vector<256x384xbf16>, vector<8x384xf32> -> vector<8x384xf32>
    %c0_3 = arith.constant 0 : index
    %c0_4 = arith.constant 0 : index
    %4 = vector.load %arg3[%c0_3, %c0_4] : memref<1x384xf32, #tpu.memory_space<vmem>>, vector<1x384xf32>
    %5 = vector.broadcast %4 : vector<1x384xf32> to vector<8x384xf32>
    %6 = arith.addf %3, %5 : vector<8x384xf32>
    %cst_5 = arith.constant 0.000000e+00 : f32
    %7 = vector.broadcast %cst_5 : f32 to vector<8x384xf32>
    %8 = arith.maximumf %6, %7 : vector<8x384xf32>
    %9 = vector.extract_strided_slice %8 {offsets = [0, 0], sizes = [8, 128], strides = [1, 1]} : vector<8x384xf32> to vector<8x128xf32>
    %10 = arith.truncf %9 : vector<8x128xf32> to vector<8x128xbf16>
    %c0_6 = arith.constant 0 : index
    %c0_7 = arith.constant 0 : index
    %c0_8 = arith.constant 0 : index
    %11 = vector.load %arg4[%c0_6, %c0_7, %c0_8] : memref<3x128x128xbf16, #tpu.memory_space<vmem>>, vector<1x128x128xbf16>
    %12 = vector.shape_cast %11 : vector<1x128x128xbf16> to vector<128x128xbf16>
    %cst_9 = arith.constant dense<0.000000e+00> : vector<8x128xf32>
    %13 = tpu.matmul %10, %12, %cst_9 {dimension_numbers = #tpu.dot_dimension_numbers<[1], [0], [0], [1], [0, 0, 1, 1], [], []>} : vector<8x128xbf16>, vector<128x128xbf16>, vector<8x128xf32> -> vector<8x128xf32>
    %c0_10 = arith.constant 0 : index
    %c0_11 = arith.constant 0 : index
    %c0_12 = arith.constant 0 : index
    %14 = vector.load %arg5[%c0_10, %c0_11, %c0_12] : memref<3x1x128xf32, #tpu.memory_space<vmem>>, vector<1x1x128xf32>
    %15 = vector.shape_cast %14 : vector<1x1x128xf32> to vector<1x128xf32>
    %16 = vector.broadcast %15 : vector<1x128xf32> to vector<8x128xf32>
    %17 = arith.addf %13, %16 : vector<8x128xf32>
    %cst_13 = arith.constant 0.000000e+00 : f32
    %18 = vector.broadcast %cst_13 : f32 to vector<8x128xf32>
    %19 = arith.maximumf %17, %18 : vector<8x128xf32>
    %20 = arith.truncf %19 : vector<8x128xf32> to vector<8x128xbf16>
    %c0_14 = arith.constant 0 : index
    %c0_15 = arith.constant 0 : index
    %c0_16 = arith.constant 0 : index
    %21 = vector.load %arg6[%c0_14, %c0_15, %c0_16] : memref<3x128x128xbf16, #tpu.memory_space<vmem>>, vector<1x128x128xbf16>
    %22 = vector.shape_cast %21 : vector<1x128x128xbf16> to vector<128x128xbf16>
    %cst_17 = arith.constant dense<0.000000e+00> : vector<8x128xf32>
    %23 = tpu.matmul %20, %22, %cst_17 {dimension_numbers = #tpu.dot_dimension_numbers<[1], [0], [0], [1], [0, 0, 1, 1], [], []>} : vector<8x128xbf16>, vector<128x128xbf16>, vector<8x128xf32> -> vector<8x128xf32>
    %c0_18 = arith.constant 0 : index
    %c0_19 = arith.constant 0 : index
    %c0_20 = arith.constant 0 : index
    %24 = vector.load %arg7[%c0_18, %c0_19, %c0_20] : memref<3x1x128xf32, #tpu.memory_space<vmem>>, vector<1x1x128xf32>
    %25 = vector.shape_cast %24 : vector<1x1x128xf32> to vector<1x128xf32>
    %26 = vector.broadcast %25 : vector<1x128xf32> to vector<8x128xf32>
    %27 = arith.addf %23, %26 : vector<8x128xf32>
    %cst_21 = arith.constant 0.000000e+00 : f32
    %28 = vector.broadcast %cst_21 : f32 to vector<8x128xf32>
    %29 = arith.maximumf %27, %28 : vector<8x128xf32>
    %30 = arith.truncf %29 : vector<8x128xf32> to vector<8x128xbf16>
    %c0_22 = arith.constant 0 : index
    %c0_23 = arith.constant 0 : index
    %c0_24 = arith.constant 0 : index
    %31 = vector.load %arg8[%c0_22, %c0_23, %c0_24] : memref<3x128x256xbf16, #tpu.memory_space<vmem>>, vector<1x128x256xbf16>
    %32 = vector.shape_cast %31 : vector<1x128x256xbf16> to vector<128x256xbf16>
    %cst_25 = arith.constant dense<0.000000e+00> : vector<8x256xf32>
    %33 = tpu.matmul %30, %32, %cst_25 {dimension_numbers = #tpu.dot_dimension_numbers<[1], [0], [0], [1], [0, 0, 1, 1], [], []>} : vector<8x128xbf16>, vector<128x256xbf16>, vector<8x256xf32> -> vector<8x256xf32>
    %c0_26 = arith.constant 0 : index
    %c0_27 = arith.constant 0 : index
    %c0_28 = arith.constant 0 : index
    %34 = vector.load %arg9[%c0_26, %c0_27, %c0_28] : memref<3x1x256xf32, #tpu.memory_space<vmem>>, vector<1x1x256xf32>
    %35 = vector.shape_cast %34 : vector<1x1x256xf32> to vector<1x256xf32>
    %36 = vector.broadcast %35 : vector<1x256xf32> to vector<8x256xf32>
    %37 = arith.addf %33, %36 : vector<8x256xf32>
    %38 = arith.negf %37 : vector<8x256xf32>
    %39 = math.exp %38 : vector<8x256xf32>
    %cst_29 = arith.constant 1.000000e+00 : f32
    %40 = vector.broadcast %cst_29 : f32 to vector<8x256xf32>
    %41 = arith.addf %40, %39 : vector<8x256xf32>
    %42 = arith.divf %40, %41 : vector<8x256xf32>
    %43 = arith.subf %42, %0 : vector<8x256xf32>
    %44 = arith.mulf %43, %43 : vector<8x256xf32>
    %cst_30 = arith.constant dense<0.000000e+00> : vector<8xf32>
    %45 = vector.multi_reduction <add>, %44, %cst_30 [1] : vector<8x256xf32> to vector<8xf32>
    %46 = vector.shape_cast %45 : vector<8xf32> to vector<8x1xf32>
    %c0_31 = arith.constant 0 : index
    %c0_32 = arith.constant 0 : index
    %47 = vector.load %arg10[%c0_31, %c0_32] : memref<8x256xf32, #tpu.memory_space<vmem>>, vector<8x256xf32>
    tpu.vector_store %arg10[%c0_31, %c0_32], %42 {strides = array<i32>} : memref<8x256xf32, #tpu.memory_space<vmem>>, vector<8x256xf32>,
    %48 = vector.extract_strided_slice %8 {offsets = [0, 128], sizes = [8, 128], strides = [1, 1]} : vector<8x384xf32> to vector<8x128xf32>
    %49 = arith.truncf %48 : vector<8x128xf32> to vector<8x128xbf16>
    %c1 = arith.constant 1 : index
    %c0_33 = arith.constant 0 : index
    %c0_34 = arith.constant 0 : index
    %50 = vector.load %arg4[%c1, %c0_33, %c0_34] : memref<3x128x128xbf16, #tpu.memory_space<vmem>>, vector<1x128x128xbf16>
    %51 = vector.shape_cast %50 : vector<1x128x128xbf16> to vector<128x128xbf16>
    %cst_35 = arith.constant dense<0.000000e+00> : vector<8x128xf32>
    %52 = tpu.matmul %49, %51, %cst_35 {dimension_numbers = #tpu.dot_dimension_numbers<[1], [0], [0], [1], [0, 0, 1, 1], [], []>} : vector<8x128xbf16>, vector<128x128xbf16>, vector<8x128xf32> -> vector<8x128xf32>
    %c1_36 = arith.constant 1 : index
    %c0_37 = arith.constant 0 : index
    %c0_38 = arith.constant 0 : index
    %53 = vector.load %arg5[%c1_36, %c0_37, %c0_38] : memref<3x1x128xf32, #tpu.memory_space<vmem>>, vector<1x1x128xf32>
    %54 = vector.shape_cast %53 : vector<1x1x128xf32> to vector<1x128xf32>
    %55 = vector.broadcast %54 : vector<1x128xf32> to vector<8x128xf32>
    %56 = arith.addf %52, %55 : vector<8x128xf32>
    %cst_39 = arith.constant 0.000000e+00 : f32
    %57 = vector.broadcast %cst_39 : f32 to vector<8x128xf32>
    %58 = arith.maximumf %56, %57 : vector<8x128xf32>
    %59 = arith.truncf %58 : vector<8x128xf32> to vector<8x128xbf16>
    %c1_40 = arith.constant 1 : index
    %c0_41 = arith.constant 0 : index
    %c0_42 = arith.constant 0 : index
    %60 = vector.load %arg6[%c1_40, %c0_41, %c0_42] : memref<3x128x128xbf16, #tpu.memory_space<vmem>>, vector<1x128x128xbf16>
    %61 = vector.shape_cast %60 : vector<1x128x128xbf16> to vector<128x128xbf16>
    %cst_43 = arith.constant dense<0.000000e+00> : vector<8x128xf32>
    %62 = tpu.matmul %59, %61, %cst_43 {dimension_numbers = #tpu.dot_dimension_numbers<[1], [0], [0], [1], [0, 0, 1, 1], [], []>} : vector<8x128xbf16>, vector<128x128xbf16>, vector<8x128xf32> -> vector<8x128xf32>
    %c1_44 = arith.constant 1 : index
    %c0_45 = arith.constant 0 : index
    %c0_46 = arith.constant 0 : index
    %63 = vector.load %arg7[%c1_44, %c0_45, %c0_46] : memref<3x1x128xf32, #tpu.memory_space<vmem>>, vector<1x1x128xf32>
    %64 = vector.shape_cast %63 : vector<1x1x128xf32> to vector<1x128xf32>
    %65 = vector.broadcast %64 : vector<1x128xf32> to vector<8x128xf32>
    %66 = arith.addf %62, %65 : vector<8x128xf32>
    %cst_47 = arith.constant 0.000000e+00 : f32
    %67 = vector.broadcast %cst_47 : f32 to vector<8x128xf32>
    %68 = arith.maximumf %66, %67 : vector<8x128xf32>
    %69 = arith.truncf %68 : vector<8x128xf32> to vector<8x128xbf16>
    %c1_48 = arith.constant 1 : index
    %c0_49 = arith.constant 0 : index
    %c0_50 = arith.constant 0 : index
    %70 = vector.load %arg8[%c1_48, %c0_49, %c0_50] : memref<3x128x256xbf16, #tpu.memory_space<vmem>>, vector<1x128x256xbf16>
    %71 = vector.shape_cast %70 : vector<1x128x256xbf16> to vector<128x256xbf16>
    %cst_51 = arith.constant dense<0.000000e+00> : vector<8x256xf32>
    %72 = tpu.matmul %69, %71, %cst_51 {dimension_numbers = #tpu.dot_dimension_numbers<[1], [0], [0], [1], [0, 0, 1, 1], [], []>} : vector<8x128xbf16>, vector<128x256xbf16>, vector<8x256xf32> -> vector<8x256xf32>
    %c1_52 = arith.constant 1 : index
    %c0_53 = arith.constant 0 : index
    %c0_54 = arith.constant 0 : index
    %73 = vector.load %arg9[%c1_52, %c0_53, %c0_54] : memref<3x1x256xf32, #tpu.memory_space<vmem>>, vector<1x1x256xf32>
    %74 = vector.shape_cast %73 : vector<1x1x256xf32> to vector<1x256xf32>
    %75 = vector.broadcast %74 : vector<1x256xf32> to vector<8x256xf32>
    %76 = arith.addf %72, %75 : vector<8x256xf32>
    %77 = arith.negf %76 : vector<8x256xf32>
    %78 = math.exp %77 : vector<8x256xf32>
    %cst_55 = arith.constant 1.000000e+00 : f32
    %79 = vector.broadcast %cst_55 : f32 to vector<8x256xf32>
    %80 = arith.addf %79, %78 : vector<8x256xf32>
    %81 = arith.divf %79, %80 : vector<8x256xf32>
    %82 = arith.subf %81, %0 : vector<8x256xf32>
    %83 = arith.mulf %82, %82 : vector<8x256xf32>
    %cst_56 = arith.constant dense<0.000000e+00> : vector<8xf32>
    %84 = vector.multi_reduction <add>, %83, %cst_56 [1] : vector<8x256xf32> to vector<8xf32>
    %85 = vector.shape_cast %84 : vector<8xf32> to vector<8x1xf32>
    %86 = arith.cmpf olt, %85, %46 : vector<8x1xf32>
    %87 = arith.select %86, %85, %46 : vector<8x1xi1>, vector<8x1xf32>
    %c0_57 = arith.constant 0 : index
    %c0_58 = arith.constant 0 : index
    %88 = vector.load %arg10[%c0_57, %c0_58] : memref<8x256xf32, #tpu.memory_space<vmem>>, vector<8x256xf32>
    %89 = vector.shape_cast %86 : vector<8x1xi1> to vector<8x1xi1>
    %90 = vector.broadcast %89 : vector<8x1xi1> to vector<8x256xi1>
    %91 = arith.select %90, %81, %88 : vector<8x256xi1>, vector<8x256xf32>
    %c0_59 = arith.constant 0 : index
    %c0_60 = arith.constant 0 : index
    %92 = vector.load %arg10[%c0_59, %c0_60] : memref<8x256xf32, #tpu.memory_space<vmem>>, vector<8x256xf32>
    tpu.vector_store %arg10[%c0_59, %c0_60], %91 {strides = array<i32>} : memref<8x256xf32, #tpu.memory_space<vmem>>, vector<8x256xf32>,
    %93 = vector.extract_strided_slice %8 {offsets = [0, 256], sizes = [8, 128], strides = [1, 1]} : vector<8x384xf32> to vector<8x128xf32>
    %94 = arith.truncf %93 : vector<8x128xf32> to vector<8x128xbf16>
    %c2 = arith.constant 2 : index
    %c0_61 = arith.constant 0 : index
    %c0_62 = arith.constant 0 : index
    %95 = vector.load %arg4[%c2, %c0_61, %c0_62] : memref<3x128x128xbf16, #tpu.memory_space<vmem>>, vector<1x128x128xbf16>
    %96 = vector.shape_cast %95 : vector<1x128x128xbf16> to vector<128x128xbf16>
    %cst_63 = arith.constant dense<0.000000e+00> : vector<8x128xf32>
    %97 = tpu.matmul %94, %96, %cst_63 {dimension_numbers = #tpu.dot_dimension_numbers<[1], [0], [0], [1], [0, 0, 1, 1], [], []>} : vector<8x128xbf16>, vector<128x128xbf16>, vector<8x128xf32> -> vector<8x128xf32>
    %c2_64 = arith.constant 2 : index
    %c0_65 = arith.constant 0 : index
    %c0_66 = arith.constant 0 : index
    %98 = vector.load %arg5[%c2_64, %c0_65, %c0_66] : memref<3x1x128xf32, #tpu.memory_space<vmem>>, vector<1x1x128xf32>
    %99 = vector.shape_cast %98 : vector<1x1x128xf32> to vector<1x128xf32>
    %100 = vector.broadcast %99 : vector<1x128xf32> to vector<8x128xf32>
    %101 = arith.addf %97, %100 : vector<8x128xf32>
    %cst_67 = arith.constant 0.000000e+00 : f32
    %102 = vector.broadcast %cst_67 : f32 to vector<8x128xf32>
    %103 = arith.maximumf %101, %102 : vector<8x128xf32>
    %104 = arith.truncf %103 : vector<8x128xf32> to vector<8x128xbf16>
    %c2_68 = arith.constant 2 : index
    %c0_69 = arith.constant 0 : index
    %c0_70 = arith.constant 0 : index
    %105 = vector.load %arg6[%c2_68, %c0_69, %c0_70] : memref<3x128x128xbf16, #tpu.memory_space<vmem>>, vector<1x128x128xbf16>
    %106 = vector.shape_cast %105 : vector<1x128x128xbf16> to vector<128x128xbf16>
    %cst_71 = arith.constant dense<0.000000e+00> : vector<8x128xf32>
    %107 = tpu.matmul %104, %106, %cst_71 {dimension_numbers = #tpu.dot_dimension_numbers<[1], [0], [0], [1], [0, 0, 1, 1], [], []>} : vector<8x128xbf16>, vector<128x128xbf16>, vector<8x128xf32> -> vector<8x128xf32>
    %c2_72 = arith.constant 2 : index
    %c0_73 = arith.constant 0 : index
    %c0_74 = arith.constant 0 : index
    %108 = vector.load %arg7[%c2_72, %c0_73, %c0_74] : memref<3x1x128xf32, #tpu.memory_space<vmem>>, vector<1x1x128xf32>
    %109 = vector.shape_cast %108 : vector<1x1x128xf32> to vector<1x128xf32>
    %110 = vector.broadcast %109 : vector<1x128xf32> to vector<8x128xf32>
    %111 = arith.addf %107, %110 : vector<8x128xf32>
    %cst_75 = arith.constant 0.000000e+00 : f32
    %112 = vector.broadcast %cst_75 : f32 to vector<8x128xf32>
    %113 = arith.maximumf %111, %112 : vector<8x128xf32>
    %114 = arith.truncf %113 : vector<8x128xf32> to vector<8x128xbf16>
    %c2_76 = arith.constant 2 : index
    %c0_77 = arith.constant 0 : index
    %c0_78 = arith.constant 0 : index
    %115 = vector.load %arg8[%c2_76, %c0_77, %c0_78] : memref<3x128x256xbf16, #tpu.memory_space<vmem>>, vector<1x128x256xbf16>
    %116 = vector.shape_cast %115 : vector<1x128x256xbf16> to vector<128x256xbf16>
    %cst_79 = arith.constant dense<0.000000e+00> : vector<8x256xf32>
    %117 = tpu.matmul %114, %116, %cst_79 {dimension_numbers = #tpu.dot_dimension_numbers<[1], [0], [0], [1], [0, 0, 1, 1], [], []>} : vector<8x128xbf16>, vector<128x256xbf16>, vector<8x256xf32> -> vector<8x256xf32>
    %c2_80 = arith.constant 2 : index
    %c0_81 = arith.constant 0 : index
    %c0_82 = arith.constant 0 : index
    %118 = vector.load %arg9[%c2_80, %c0_81, %c0_82] : memref<3x1x256xf32, #tpu.memory_space<vmem>>, vector<1x1x256xf32>
    %119 = vector.shape_cast %118 : vector<1x1x256xf32> to vector<1x256xf32>
    %120 = vector.broadcast %119 : vector<1x256xf32> to vector<8x256xf32>
    %121 = arith.addf %117, %120 : vector<8x256xf32>
    %122 = arith.negf %121 : vector<8x256xf32>
    %123 = math.exp %122 : vector<8x256xf32>
    %cst_83 = arith.constant 1.000000e+00 : f32
    %124 = vector.broadcast %cst_83 : f32 to vector<8x256xf32>
    %125 = arith.addf %124, %123 : vector<8x256xf32>
    %126 = arith.divf %124, %125 : vector<8x256xf32>
    %127 = arith.subf %126, %0 : vector<8x256xf32>
    %128 = arith.mulf %127, %127 : vector<8x256xf32>
    %cst_84 = arith.constant dense<0.000000e+00> : vector<8xf32>
    %129 = vector.multi_reduction <add>, %128, %cst_84 [1] : vector<8x256xf32> to vector<8xf32>
    %130 = vector.shape_cast %129 : vector<8xf32> to vector<8x1xf32>
    %131 = arith.cmpf olt, %130, %87 : vector<8x1xf32>
    %c0_85 = arith.constant 0 : index
    %c0_86 = arith.constant 0 : index
    %132 = vector.load %arg10[%c0_85, %c0_86] : memref<8x256xf32, #tpu.memory_space<vmem>>, vector<8x256xf32>
    %133 = vector.shape_cast %131 : vector<8x1xi1> to vector<8x1xi1>
    %134 = vector.broadcast %133 : vector<8x1xi1> to vector<8x256xi1>
    %135 = arith.select %134, %126, %132 : vector<8x256xi1>, vector<8x256xf32>
    %c0_87 = arith.constant 0 : index
    %c0_88 = arith.constant 0 : index
    %136 = vector.load %arg10[%c0_87, %c0_88] : memref<8x256xf32, #tpu.memory_space<vmem>>, vector<8x256xf32>
    tpu.vector_store %arg10[%c0_87, %c0_88], %135 {strides = array<i32>} : memref<8x256xf32, #tpu.memory_space<vmem>>, vector<8x256xf32>,
    return
  }
  func.func @transform_0(%arg0: i32) -> (i32, i32) {
    %c0_i32 = arith.constant 0 : i32
    %c0_i32_0 = arith.constant 0 : i32
    return %arg0, %c0_i32 : i32, i32
  }
  func.func @transform_1(%arg0: i32) -> (i32, i32) {
    %c0_i32 = arith.constant 0 : i32
    %c0_i32_0 = arith.constant 0 : i32
    %c0_i32_1 = arith.constant 0 : i32
    return %c0_i32, %c0_i32_0 : i32, i32
  }
  func.func @transform_2(%arg0: i32) -> (i32, i32) {
    %c0_i32 = arith.constant 0 : i32
    %c0_i32_0 = arith.constant 0 : i32
    %c0_i32_1 = arith.constant 0 : i32
    return %c0_i32, %c0_i32_0 : i32, i32
  }
  func.func @transform_3(%arg0: i32) -> (i32, i32, i32) {
    %c0_i32 = arith.constant 0 : i32
    %c0_i32_0 = arith.constant 0 : i32
    %c0_i32_1 = arith.constant 0 : i32
    %c0_i32_2 = arith.constant 0 : i32
    return %c0_i32, %c0_i32_0, %c0_i32_1 : i32, i32, i32
  }
  func.func @transform_4(%arg0: i32) -> (i32, i32, i32) {
    %c0_i32 = arith.constant 0 : i32
    %c0_i32_0 = arith.constant 0 : i32
    %c0_i32_1 = arith.constant 0 : i32
    %c0_i32_2 = arith.constant 0 : i32
    return %c0_i32, %c0_i32_0, %c0_i32_1 : i32, i32, i32
  }
  func.func @transform_5(%arg0: i32) -> (i32, i32, i32) {
    %c0_i32 = arith.constant 0 : i32
    %c0_i32_0 = arith.constant 0 : i32
    %c0_i32_1 = arith.constant 0 : i32
    %c0_i32_2 = arith.constant 0 : i32
    return %c0_i32, %c0_i32_0, %c0_i32_1 : i32, i32, i32
  }
  func.func @transform_6(%arg0: i32) -> (i32, i32, i32) {
    %c0_i32 = arith.constant 0 : i32
    %c0_i32_0 = arith.constant 0 : i32
    %c0_i32_1 = arith.constant 0 : i32
    %c0_i32_2 = arith.constant 0 : i32
    return %c0_i32, %c0_i32_0, %c0_i32_1 : i32, i32, i32
  }
  func.func @transform_7(%arg0: i32) -> (i32, i32, i32) {
    %c0_i32 = arith.constant 0 : i32
    %c0_i32_0 = arith.constant 0 : i32
    %c0_i32_1 = arith.constant 0 : i32
    %c0_i32_2 = arith.constant 0 : i32
    return %c0_i32, %c0_i32_0, %c0_i32_1 : i32, i32, i32
  }
  func.func @transform_8(%arg0: i32) -> (i32, i32, i32) {
    %c0_i32 = arith.constant 0 : i32
    %c0_i32_0 = arith.constant 0 : i32
    %c0_i32_1 = arith.constant 0 : i32
    %c0_i32_2 = arith.constant 0 : i32
    return %c0_i32, %c0_i32_0, %c0_i32_1 : i32, i32, i32
  }
  func.func @transform_9(%arg0: i32) -> (i32, i32) {
    %c0_i32 = arith.constant 0 : i32
    %c0_i32_0 = arith.constant 0 : i32
    return %arg0, %c0_i32 : i32, i32
  }
}

</mosaic_0001>

<bundles_post_ra>
// kernel: tpu_custom_call.1
= control target key start
LH: loop header
LB: loop body
LE: loop exit
PB: predicated region body
PF: predicated region fallthrough
CT: control target
= control target key end

     0   :  { %14 = vsyncpa [#allocation3], 0  ;;  %s2729_s0 = inlined_call_operand.hbm [shape: f32[8,256], index: 0, kind: input, shape index: {}]   ;;  %s2730_s1 = inlined_call_operand.hbm [shape: bf16[256,384], index: 1, kind: input, shape index: {}]   ;;  %s2731_s2 = inlined_call_operand.vmem [shape: f32[1,384], index: 2, kind: input, shape index: {}]   ;;  %s2732_s3 = inlined_call_operand.hbm [shape: bf16[3,128,128], index: 3, kind: input, shape index: {}]   ;;  %s2733_s4 = inlined_call_operand.vmem [shape: f32[3,1,128], index: 4, kind: input, shape index: {}]   ;;  %s2734_s5 = inlined_call_operand.hbm [shape: bf16[3,128,128], index: 5, kind: input, shape index: {}]   ;;  %s2735_s6 = inlined_call_operand.hbm [shape: f32[3,1,128], index: 6, kind: input, shape index: {}]   ;;  %s2736_s7 = inlined_call_operand.hbm [shape: bf16[3,128,256], index: 7, kind: input, shape index: {}]   ;;  %s2737_s8 = inlined_call_operand.vmem [shape: f32[3,1,256], index: 8, kind: input, shape index: {}]   ;;  %s2738_s9 = inlined_call_operand.hbm [shape: f32[8,256], index: 9, kind: output, shape index: {}]  }
   0x1   :  { %15 = vsyncpa [#allocation6], 0 }
   0x2   :  { %16 = vsyncpa [#allocation9], 0 }
   0x3   :  { %17 = vsyncpa [#allocation12], 0 }
   0x4   :  { %18 = vsyncpa [#allocation4], 0  ;;  %s2509_s30 = smov [#allocation5]  }
   0x5   :  { %s34_s10 = sshll.u32 %s2509_s30, 4  ;;  %s35_s10 = int_to_ptr.vmem [resolvable:$true] %s34_s10 }
   0x6   :  { %s2367_s11 = scalar_lea.vmem %s35_s10, 6144  ;;  %p2372_p1 = scmp.lt.s32.totalorder %s35_s10, %s35_s10 }
   0x7   :  { %p2368_p0 = scmp.ne.s32.totalorder %s35_s10, %s2367_s11  ;;  %p2373_p2 = scmp.lt.s32.totalorder %s2367_s11, %s2367_s11 }
   0x9   :  { %p2374_p3 = por %p2373_p2, %p2372_p1 }
   0xb   :  { %p2375_p4 = pnand %p2374_p3, %p2368_p0 }
   0xd   :  { %2378 = shalt.err (!%p2375_p4)
}
   0xe   :  { %s2510_s12 = smov 192   ;;  %s2511_s13 = smov 12  }
   0xf   :  { %40 = dma.hbm_to_vmem [thread:$0]  %s2730_s1, 6144, %s35_s10, [#allocation6], %s2510_s12, %s2510_s12, %s2511_s13  }
  0x10   :  { %s2512_s16 = smov [#allocation8]   ;;  %s2513_s18 = smov [#allocation2]  }
  0x11   :  { %s62_s17 = sshll.u32 %s2512_s16, 4  ;;  %s25_s19 = sshll.u32 %s2513_s18, 4  ;;  %s63_s17 = int_to_ptr.vmem [resolvable:$true] %s62_s17  ;;  %s26_s19 = int_to_ptr.vmem [resolvable:$true] %s25_s19 }
  0x12   :  { %s2387_s20 = scalar_lea.vmem %s63_s17, 3072  ;;  %p2392_p6 = scmp.lt.s32.totalorder %s63_s17, %s63_s17 }
  0x13   :  { %p2388_p5 = scmp.ne.s32.totalorder %s63_s17, %s2387_s20  ;;  %p2393_p7 = scmp.lt.s32.totalorder %s2387_s20, %s2387_s20 }
  0x15   :  { %p2394_p8 = por %p2393_p7, %p2392_p6 }
  0x17   :  { %p2395_p9 = pnand %p2394_p8, %p2388_p5 }
  0x19   :  { %2398 = shalt.err (!%p2395_p9)
}
  0x1a   :  { %s2514_s21 = smov 64   ;;  %s2515_s22 = smov 4  }
  0x1b   :  { %68 = dma.hbm_to_vmem [thread:$0]  %s2734_s5, 3072, %s63_s17, [#allocation9], %s2514_s21, %s2514_s21, %s2515_s22  }
  0x1c   :  { %s2407_s1 = scalar_lea.vmem %s26_s19, 256  ;;  %p2412_p11 = scmp.lt.s32.totalorder %s26_s19, %s26_s19 }
  0x1d   :  { %p2408_p10 = scmp.ne.s32.totalorder %s26_s19, %s2407_s1  ;;  %p2413_p12 = scmp.lt.s32.totalorder %s2407_s1, %s2407_s1 }
  0x1f   :  { %p2414_p13 = por %p2413_p12, %p2412_p11 }
  0x21   :  { %p2415_p0 = pnand %p2414_p13, %p2408_p10 }
  0x23   :  { %2418 = shalt.err (!%p2415_p0)
}
  0x24   :  { %28 = dma.hbm_to_vmem [thread:$0]  %s2729_s0, 256, %s26_s19, [#allocation3]  }
  0x25   :  { %s2516_s27 = smov [#allocation7]   ;;  %s2517_s29 = smov [#allocation10]  }
  0x26   :  { %s48_s28 = sshll.u32 %s2516_s27, 4  ;;  %s74_s30 = sshll.u32 %s2517_s29, 4  ;;  %s49_s28 = int_to_ptr.vmem [resolvable:$true] %s48_s28  ;;  %s75_s30 = int_to_ptr.vmem [resolvable:$true] %s74_s30 }
  0x27   :  { %s2427_s10 = scalar_lea.vmem %s49_s28, 3072  ;;  %p2432_p2 = scmp.lt.s32.totalorder %s49_s28, %s49_s28 }
  0x28   :  { %p2428_p1 = scmp.ne.s32.totalorder %s49_s28, %s2427_s10  ;;  %p2433_p3 = scmp.lt.s32.totalorder %s2427_s10, %s2427_s10 }
  0x2a   :  { %p2434_p4 = por %p2433_p3, %p2432_p2 }
  0x2c   :  { %p2435_p5 = pnand %p2434_p4, %p2428_p1 }
  0x2e   :  { %2438 = shalt.err (!%p2435_p5)
}
  0x2f   :  { %54 = dma.hbm_to_vmem [thread:$0]  %s2732_s3, 3072, %s49_s28, [#allocation6], %s2514_s21, %s2514_s21, %s2515_s22  }
  0x30   :  { %s2447_s12 = scalar_lea.vmem %s75_s30, 48  ;;  %s2451_s0 = scalar_lea.vmem %s75_s30, 64 }
  0x31   :  { %p2448_p6 = scmp.ne.s32.totalorder %s75_s30, %s2447_s12  ;;  %p2452_p7 = scmp.lt.s32.totalorder %s75_s30, %s75_s30 }
  0x32   :  { %p2453_p8 = scmp.lt.s32.totalorder %s2451_s0, %s2447_s12 }
  0x34   :  { %p2454_p9 = por %p2453_p8, %p2452_p7 }
  0x36   :  { %p2455_p10 = pnand %p2454_p9, %p2448_p6 }
  0x38   :  { %2458 = shalt.err (!%p2455_p10)
}
  0x39   :  { %s2518_s13 = smov 16   ;;  %s2519_s14 = smov 1  }
  0x3a   :  { %80 = dma.hbm_to_vmem [thread:$0]  %s2735_s6, 48, %s75_s30, [#allocation9], %s2518_s13, %s2518_s13, %s2519_s14  }
  0x3b   :  { %s2520_s17 = smov [#allocation11]  }
  0x3c   :  { %s86_s18 = sshll.u32 %s2520_s17, 4  ;;  %s87_s18 = int_to_ptr.vmem [resolvable:$true] %s86_s18 }
  0x3d   :  { %s2467_s19 = scalar_lea.vmem %s87_s18, 6144  ;;  %p2472_p12 = scmp.lt.s32.totalorder %s87_s18, %s87_s18 }
  0x3e   :  { %p2468_p11 = scmp.ne.s32.totalorder %s87_s18, %s2467_s19  ;;  %p2473_p13 = scmp.lt.s32.totalorder %s2467_s19, %s2467_s19 }
  0x40   :  { %p2474_p0 = por %p2473_p13, %p2472_p12 }
  0x42   :  { %p2475_p1 = pnand %p2474_p0, %p2468_p11 }
  0x44   :  { %2478 = shalt.err (!%p2475_p1)
}
  0x45   :  { %s2521_s3 = smov 128   ;;  %s2522_s20 = smov 8  }
  0x46   :  { %92 = dma.hbm_to_vmem [thread:$0]  %s2736_s7, 6144, %s87_s18, [#allocation12], %s2521_s3, %s2521_s3, %s2522_s20  }
  0x47   :  { %2499 = dma.done.wait [#allocation3], 256  }
  0x48   :  { %2500 = vsyncadd [#allocation3], 4294967040 }
  0x49   :  { %2501 = dma.done.wait [#allocation6], 9216  }
  0x4a   :  { %2502 = vsyncadd [#allocation6], 4294958080 }
  0x4b   :  { %2503 = dma.done.wait [#allocation9], 3120  }
  0x4c   :  { %2504 = vsyncadd [#allocation9], 4294964176 }
  0x4d   :  { %2505 = dma.done.wait [#allocation12], 6144  }
  0x4e   :  { %2506 = vsyncadd [#allocation12], 4294961152  ;;  %v2149_v0 = vld [vmem:[#allocation5 + $0xac] ss:$12 sps:$4 sm:$0xff]   ;;  %v2151_v1 = vld [vmem:[#allocation5 + $0xa8] ss:$12 sps:$4 sm:$0xff]  }
  0x4f   :  { %455 = vmatprep.subr.bf16.mxu0 %v2149_v0  ;;  %v2152_v2 = vld [vmem:[#allocation5 + $0x94] ss:$12 sps:$4 sm:$0xff]   ;;  %v2154_v3 = vld [vmem:[#allocation5 + $0x90] ss:$12 sps:$4 sm:$0xff]   ;;  %v2157_v5 = vld [vmem:[#allocation5 + $0x78] ss:$12 sps:$4 sm:$0xff]  }
  0x50   :  { %456 = vmatpush1.bf16.msra.mxu0 %v2151_v1  ;;  %v2155_v4 = vld [vmem:[#allocation5 + $0x7c] ss:$12 sps:$4 sm:$0xff]   ;;  %v2158_v6 = vld [vmem:[#allocation5 + $0x64] ss:$12 sps:$4 sm:$0xff]   ;;  %v2160_v7 = vld [vmem:[#allocation5 + $0x60] ss:$12 sps:$4 sm:$0xff]  }
  0x51   :  { %457 = vmatprep.subr.bf16.mxu0 %v2152_v2  ;;  %v2161_v8 = vld [vmem:[#allocation5 + $0x4c] ss:$12 sps:$4 sm:$0xff]   ;;  %v2163_v9 = vld [vmem:[#allocation5 + $0x48] ss:$12 sps:$4 sm:$0xff]   ;;  %v2166_v11 = vld [vmem:[#allocation5 + $0x30] ss:$12 sps:$4 sm:$0xff]  }
  0x52   :  { %v2164_v10 = vld [vmem:[#allocation5 + $0x34] ss:$12 sps:$4 sm:$0xff]   ;;  %v2167_v12 = vld [vmem:[#allocation5 + $0x1c] ss:$12 sps:$4 sm:$0xff]   ;;  %v2169_v13 = vld [vmem:[#allocation5 + $0x18] ss:$12 sps:$4 sm:$0xff]  }
  0x53   :  { %v115_v14 = vld [vmem:[#allocation2 + $0x8] sm:$0xff]  ;;  %v2170_v15 = vld [vmem:[#allocation5 + $0x4] ss:$12 sps:$4 sm:$0xff]   ;;  %v2172_v20 = vld [vmem:[#allocation5] ss:$12 sps:$4 sm:$0xff]   ;;  %v2523_v52 = vmov 0.0  }
  0x54   :  { %458 = vmatpush1.bf16.msra.mxu0 %v2154_v3  ;;  %v117_v16 = vpack.c.bf16 %v115_v14, %v115_v14  ;;  %v2197_v17 = vld [vmem:[#allocation5 + $0x170] ss:$12 sps:$4 sm:$0xff]   ;;  %v2199_v19 = vld [vmem:[#allocation5 + $0x158] ss:$12 sps:$4 sm:$0xff]   ;;  %v2201_v22 = vld [vmem:[#allocation5 + $0x140] ss:$12 sps:$4 sm:$0xff]  }
  0x55   :  { %459 = vmatprep.subr.bf16.mxu0 %v2155_v4  ;;  %v2198_v18 = vld [vmem:[#allocation5 + $0xb0] ss:$12 sps:$4 sm:$0xff]   ;;  %1935 = vmatprep.subr.bf16.mxu1 %v2197_v17  ;;  %v2200_v21 = vld [vmem:[#allocation5 + $0x98] ss:$12 sps:$4 sm:$0xff]   ;;  %v2175_v24 = vld [vmem:[#allocation5 + $0x168] ss:$12 sps:$4 sm:$0xff]   ;;  %v184_v4 = vlaneseq }
  0x56   :  { %487 = vmatprep.mubr.bf16.mxu0 %v117_v16  ;;  %528 = vmatprep.mubr.bf16.mxu1 %v117_v16  ;;  %v2173_v23 = vld [vmem:[#allocation5 + $0x16c] ss:$12 sps:$4 sm:$0xff]   ;;  %v2203_v26 = vld [vmem:[#allocation5 + $0x128] ss:$12 sps:$4 sm:$0xff]   ;;  %v2178_v28 = vld [vmem:[#allocation5 + $0x150] ss:$12 sps:$4 sm:$0xff]  }
  0x57   :  { %1936 = vmatpush3.bf16.msra.mxu1 %v2198_v18  ;;  %v2202_v25 = vld [vmem:[#allocation5 + $0x80] ss:$12 sps:$4 sm:$0xff]   ;;  %v2204_v29 = vld [vmem:[#allocation5 + $0x68] ss:$12 sps:$4 sm:$0xff]   ;;  %v2205_v30 = vld [vmem:[#allocation5 + $0x110] ss:$12 sps:$4 sm:$0xff]  }
  0x58   :  { %460 = vmatpush1.bf16.msra.mxu0 %v2157_v5  ;;  %1937 = vmatprep.subr.bf16.mxu1 %v2199_v19  ;;  %v2176_v27 = vld [vmem:[#allocation5 + $0x154] ss:$12 sps:$4 sm:$0xff]   ;;  %v2179_v31 = vld [vmem:[#allocation5 + $0x13c] ss:$12 sps:$4 sm:$0xff]   ;;  %v2181_v32 = vld [vmem:[#allocation5 + $0x138] ss:$12 sps:$4 sm:$0xff]  }
  0x59   :  { %461 = vmatprep.subr.bf16.mxu0 %v2158_v6  ;;  %v2206_v33 = vld [vmem:[#allocation5 + $0x50] ss:$12 sps:$4 sm:$0xff]   ;;  %v2207_v34 = vld [vmem:[#allocation5 + $0xf8] ss:$12 sps:$4 sm:$0xff]   ;;  %v2184_v36 = vld [vmem:[#allocation5 + $0x120] ss:$12 sps:$4 sm:$0xff]  }
  0x5a   :  { %v2182_v35 = vld [vmem:[#allocation5 + $0x124] ss:$12 sps:$4 sm:$0xff]   ;;  %v2185_v37 = vld [vmem:[#allocation5 + $0x10c] ss:$12 sps:$4 sm:$0xff]   ;;  %v2187_v41 = vld [vmem:[#allocation5 + $0x108] ss:$12 sps:$4 sm:$0xff]  }
  0x5b   :  { %1938 = vmatpush3.bf16.msra.mxu1 %v2200_v21  ;;  %v2208_v38 = vld [vmem:[#allocation5 + $0x38] ss:$12 sps:$4 sm:$0xff]   ;;  %v2209_v39 = vld [vmem:[#allocation5 + $0xe0] ss:$12 sps:$4 sm:$0xff]   ;;  %v2211_v42 = vld [vmem:[#allocation5 + $0xc8] ss:$12 sps:$4 sm:$0xff]  }
  0x5c   :  { %462 = vmatpush1.bf16.msra.mxu0 %v2160_v7  ;;  %1939 = vmatprep.subr.bf16.mxu1 %v2201_v22  ;;  %v2210_v40 = vld [vmem:[#allocation5 + $0x20] ss:$12 sps:$4 sm:$0xff]   ;;  %v2212_v44 = vld [vmem:[#allocation5 + $0x8] ss:$12 sps:$4 sm:$0xff]   ;;  %v2190_v45 = vld [vmem:[#allocation5 + $0xf0] ss:$12 sps:$4 sm:$0xff]  }
  0x5d   :  { %463 = vmatprep.subr.bf16.mxu0 %v2161_v8  ;;  %v2188_v43 = vld [vmem:[#allocation5 + $0xf4] ss:$12 sps:$4 sm:$0xff]   ;;  %v2191_v46 = vld [vmem:[#allocation5 + $0xdc] ss:$12 sps:$4 sm:$0xff]   ;;  %v2193_v49 = vld [vmem:[#allocation5 + $0xd8] ss:$12 sps:$4 sm:$0xff]  }
  0x5e   :  { %v2595_v47 = vld [vmem:[#allocation2] sm:$0xff]  ;;  %v2213_v48 = vld [vmem:[#allocation7 + $0x38] sm:$0xff]   ;;  %v2196_v54 = vld [vmem:[#allocation5 + $0xc0] ss:$12 sps:$4 sm:$0xff]   ;;  %vm2524_vm0 = vmmov 0   ;;  %v2619_v5 = vshrl.u32 %v184_v4, 7 }
  0x5f   :  { %1940 = vmatpush3.bf16.msra.mxu1 %v2202_v25  ;;  %v2194_v50 = vld [vmem:[#allocation5 + $0xc4] ss:$12 sps:$4 sm:$0xff]   ;;  %v116_v51 = vpack.c.bf16 %v2595_v47, %v2595_v47  ;;  %v2215_v55 = vld [vmem:[#allocation7 + $0x28] sm:$0xff]   ;;  %v2217_v57 = vld [vmem:[#allocation7 + $0x18] sm:$0xff]  }
  0x60   :  { %464 = vmatpush1.bf16.msra.mxu0 %v2163_v9  ;;  %1941 = vmatprep.subr.bf16.mxu1 %v2203_v26  ;;  %v2214_v53 = vld [vmem:[#allocation7 + $0x30] sm:$0xff]   ;;  %v2216_v56 = vld [vmem:[#allocation7 + $0x20] sm:$0xff]   ;;  %v2219_v59 = vld [vmem:[#allocation7 + $0x8] sm:$0xff]   ;;  %v2622_v7 = vsub.s32 0, %v2619_v5 }
  0x61   :  { %465 = vmatprep.subr.bf16.mxu0 %v2164_v10  ;;  %v2218_v58 = vld [vmem:[#allocation7 + $0x10] sm:$0xff]   ;;  %v2220_v60 = vld [vmem:[#allocation7] sm:$0xff]   ;;  %v2221_v61 = vld [vmem:[#allocation8 + $0x38] sm:$0xff]  }
  0x62   :  { %v2222_v62 = vld [vmem:[#allocation8 + $0x30] sm:$0xff]   ;;  %v2223_v63 = vld [vmem:[#allocation8 + $0x28] sm:$0xff]   ;;  %v2224_v0 = vld [vmem:[#allocation8 + $0x20] sm:$0xff]  }
  0x63   :  { %1942 = vmatpush3.bf16.msra.mxu1 %v2204_v29  ;;  %v2225_v1 = vld [vmem:[#allocation8 + $0x18] sm:$0xff]   ;;  %v2226_v2 = vld [vmem:[#allocation8 + $0x10] sm:$0xff]   ;;  %v2227_v3 = vld [vmem:[#allocation8 + $0x8] sm:$0xff]  }
  0x64   :  { %466 = vmatpush1.bf16.msra.mxu0 %v2166_v11  ;;  %1943 = vmatprep.subr.bf16.mxu1 %v2205_v30  ;;  %v2627_v9 = vld [vmem:[%s2731_s2] sm:$0x7]  ;;  %v2228_v21 = vld [vmem:[#allocation8] sm:$0xff]   ;;  %v2237_v22 = vld [vmem:[#allocation11 + $0x70] ss:$8 sps:$4 sm:$0xff]  }
  0x65   :  { %467 = vmatprep.subr.bf16.mxu0 %v2167_v12  ;;  %v187_v12 = vrot.slane %v2627_v9, %v2622_v7  ;;  %v2240_v25 = vld [vmem:[#allocation11 + $0x60] ss:$8 sps:$4 sm:$0xff]   ;;  %v2245_v26 = vld [vmem:[#allocation11 + $0x54] ss:$8 sps:$4 sm:$0xff]  }
  0x66   :  { %v2246_v29 = vld [vmem:[#allocation11 + $0x40] ss:$8 sps:$4 sm:$0xff]   ;;  %v2251_v30 = vld [vmem:[#allocation11 + $0x34] ss:$8 sps:$4 sm:$0xff]  }
  0x67   :  { %1944 = vmatpush3.bf16.msra.mxu1 %v2206_v33  ;;  %v2252_v33 = vld [vmem:[#allocation11 + $0x20] ss:$8 sps:$4 sm:$0xff]   ;;  %v2261_v4 = vld [vmem:[#allocation8 + $0x78] sm:$0xff]  }
  0x68   :  { %468 = vmatpush1.bf16.msra.mxu0 %v2169_v13  ;;  %1945 = vmatprep.subr.bf16.mxu1 %v2207_v34  ;;  %v2257_v34 = vld [vmem:[#allocation11 + $0x14] ss:$8 sps:$4 sm:$0xff]  }
  0x69   :  { %469 = vmatprep.subr.bf16.mxu0 %v2170_v15 }
  0x6b   :  { %1946 = vmatpush3.bf16.msra.mxu1 %v2208_v38 }
  0x6c   :  { %470 = vmatpush1.bf16.msra.mxu0 %v2172_v20  ;;  %1947 = vmatprep.subr.bf16.mxu1 %v2209_v39 }
  0x6d   :  { %471 = vmatprep.subr.bf16.mxu0 %v2173_v23  ;;  %v2239_v23 = vld [vmem:[#allocation11 + $0x74] ss:$8 sps:$4 sm:$0xff]  }
  0x6f   :  { %1948 = vmatpush3.bf16.msra.mxu1 %v2210_v40 }
  0x70   :  { %472 = vmatpush2.bf16.msra.mxu0 %v2175_v24  ;;  %1949 = vmatprep.subr.bf16.mxu1 %v2211_v42  ;;  %v2242_v24 = vld [vmem:[#allocation11 + $0x64] ss:$8 sps:$4 sm:$0xff]   ;;  %v2229_v42 = vld [vmem:[#allocation7 + $0x78] sm:$0xff]  }
  0x71   :  { %473 = vmatprep.subr.bf16.mxu0 %v2176_v27  ;;  %v2243_v27 = vld [vmem:[#allocation11 + $0x50] ss:$8 sps:$4 sm:$0xff]  }
  0x73   :  { %1950 = vmatpush3.bf16.msra.mxu1 %v2212_v44 }
  0x74   :  { %474 = vmatpush2.bf16.msra.mxu0 %v2178_v28  ;;  %2011 = vmatprep.subr.bf16.mxu1 %v2523_v52  ;;  %v2248_v28 = vld [vmem:[#allocation11 + $0x44] ss:$8 sps:$4 sm:$0xff]  }
  0x75   :  { %475 = vmatprep.subr.bf16.mxu0 %v2179_v31  ;;  %v2249_v31 = vld [vmem:[#allocation11 + $0x30] ss:$8 sps:$4 sm:$0xff]  }
  0x76   :  { %529 = vmatmul.mubr.bf16.vlgmr.msra.gmra.mxu1 %v116_v51 }
  0x77   :  { %2012 = vmatpush3.bf16.msra.mxu1 %v2213_v48  ;;  %2027 = vmatprep.mubr.msk.bf16.mxu1 %vm2524_vm0, %v2523_v52  ;;  %v2232_v48 = vld [vmem:[#allocation7 + $0x60] sm:$0xff]  }
  0x78   :  { %476 = vmatpush2.bf16.msra.mxu0 %v2181_v32  ;;  %2013 = vmatprep.subr.bf16.mxu1 %v2523_v52  ;;  %v2254_v32 = vld [vmem:[#allocation11 + $0x24] ss:$8 sps:$4 sm:$0xff]  }
  0x79   :  { %477 = vmatprep.subr.bf16.mxu0 %v2182_v35  ;;  %v2255_v35 = vld [vmem:[#allocation11 + $0x10] ss:$8 sps:$4 sm:$0xff]  }
  0x7b   :  { %2014 = vmatpush3.bf16.msra.mxu1 %v2214_v53 }
  0x7c   :  { %478 = vmatpush2.bf16.msra.mxu0 %v2184_v36  ;;  %2015 = vmatprep.subr.bf16.mxu1 %v2523_v52  ;;  %v1823_v36 = vld [vmem:[%s2733_s4] ss:$0 sm:$0xff] }
  0x7d   :  { %479 = vmatprep.subr.bf16.mxu0 %v2185_v37 }
  0x7f   :  { %2016 = vmatpush3.bf16.msra.mxu1 %v2215_v55 }
  0x80   :  { %480 = vmatpush2.bf16.msra.mxu0 %v2187_v41  ;;  %2017 = vmatprep.subr.bf16.mxu1 %v2523_v52 }
  0x81   :  { %481 = vmatprep.subr.bf16.mxu0 %v2188_v43 }
  0x83   :  { %2018 = vmatpush3.bf16.msra.mxu1 %v2216_v56  ;;  %v2236_v56 = vld [vmem:[#allocation7 + $0x40] sm:$0xff]  }
  0x84   :  { %482 = vmatpush2.bf16.msra.mxu0 %v2190_v45  ;;  %2019 = vmatprep.subr.bf16.mxu1 %v2523_v52  ;;  %v2230_v45 = vld [vmem:[#allocation7 + $0x70] sm:$0xff]  }
  0x85   :  { %483 = vmatprep.subr.bf16.mxu0 %v2191_v46  ;;  %v2231_v46 = vld [vmem:[#allocation7 + $0x68] sm:$0xff]  }
  0x87   :  { %2020 = vmatpush3.bf16.msra.mxu1 %v2217_v57 }
  0x88   :  { %484 = vmatpush2.bf16.msra.mxu0 %v2193_v49  ;;  %2021 = vmatprep.subr.bf16.mxu1 %v2523_v52  ;;  %v2233_v49 = vld [vmem:[#allocation7 + $0x58] sm:$0xff]  }
  0x89   :  { %485 = vmatprep.subr.bf16.mxu0 %v2194_v50  ;;  %v2645_v50 = vsub.s32 1, %v2619_v5 }
  0x8b   :  { %2022 = vmatpush3.bf16.msra.mxu1 %v2218_v58  ;;  %v191_v53 = vrot.slane %v2627_v9, %v2645_v50 }
  0x8c   :  { %486 = vmatpush2.bf16.msra.mxu0 %v2196_v54  ;;  %2023 = vmatprep.subr.bf16.mxu1 %v2523_v52  ;;  %v2235_v54 = vld [vmem:[#allocation7 + $0x48] sm:$0xff]  }
  0x8d   :  { %2031 = vmatprep.subr.bf16.mxu0 %v2523_v52 }
  0x8f   :  { %488 = vmatmul.mubr.bf16.vlgmr.msra.gmra.mxu0 %v116_v51  ;;  %2024 = vmatpush3.bf16.msra.mxu1 %v2219_v59  ;;  %v2234_v51 = vld [vmem:[#allocation7 + $0x50] sm:$0xff]  }
  0x90   :  { %2025 = vmatprep.subr.bf16.mxu1 %v2523_v52  ;;  %2047 = vmatprep.mubr.msk.bf16.mxu0 %vm2524_vm0, %v2523_v52  ;;  %v2260_v59 = vld [vmem:[#allocation11 + $0x4] ss:$8 sps:$4 sm:$0xff]  }
  0x91   :  { %2032 = vmatpush3.bf16.msra.mxu0 %v2221_v61  ;;  %v2525_v61 = vmov 0  }
  0x92   :  { %2033 = vmatprep.subr.bf16.mxu0 %v2523_v52 }
  0x93   :  { %2026 = vmatpush3.bf16.msra.mxu1 %v2220_v60  ;;  %v2258_v60 = vld [vmem:[#allocation11] ss:$8 sps:$4 sm:$0xff]  }
  0x94   :  { %874 = vmatprep.subr.bf16.mxu1 %v2239_v23 }
  0x95   :  { %2034 = vmatpush3.bf16.msra.mxu0 %v2222_v62  ;;  %v1832_v62 = vld [vmem:[#allocation10] ss:$0 sm:$0xff] }
  0x96   :  { %2035 = vmatprep.subr.bf16.mxu0 %v2523_v52 }
  0x99   :  { %2036 = vmatpush3.bf16.msra.mxu0 %v2223_v63 }
  0x9a   :  { %2037 = vmatprep.subr.bf16.mxu0 %v2523_v52 }
  0x9d   :  { %2038 = vmatpush3.bf16.msra.mxu0 %v2224_v0 }
  0x9e   :  { %2039 = vmatprep.subr.bf16.mxu0 %v2523_v52 }
  0xa1   :  { %2040 = vmatpush3.bf16.msra.mxu0 %v2225_v1 }
  0xa2   :  { %2041 = vmatprep.subr.bf16.mxu0 %v2523_v52 }
  0xa5   :  { %2042 = vmatpush3.bf16.msra.mxu0 %v2226_v2 }
  0xa6   :  { %2043 = vmatprep.subr.bf16.mxu0 %v2523_v52 }
  0xa9   :  { %2044 = vmatpush3.bf16.msra.mxu0 %v2227_v3 }
  0xaa   :  { %2045 = vmatprep.subr.bf16.mxu0 %v2523_v52 }
  0xad   :  { %2046 = vmatpush3.bf16.msra.mxu0 %v2228_v21 }
  0xae   :  { %2051 = vmatprep.subr.bf16.mxu0 %v2523_v52 }
 0x136   :  { %v1951_v6 = vpop.f32.mrf.mxu1 }
 0x138   :  { %v1952_v8 = vpop.f32.mrf.mxu1 }
 0x139   :  { %v2629_v10 = vadd.f32 %v1952_v8, %v1951_v6 }
 0x13a   :  { %v1954_v11 = vpop.f32.mrf.mxu1 }
 0x13b   :  { %v2262_v11 = vld [vmem:[#allocation8 + $0x70] sm:$0xff]  }
 0x13c   :  { %v1955_v13 = vpop.f32.mrf.mxu1 }
 0x13d   :  { %v2264_v13 = vld [vmem:[#allocation8 + $0x60] sm:$0xff]  }
 0x14f   :  { %v489_v14 = vpop.f32.mrf.mxu0 }
 0x150   :  { %v490_v15 = vadd.f32 %v489_v14, %v187_v12  ;;  %v2263_v12 = vld [vmem:[#allocation8 + $0x68] sm:$0xff]   ;;  %v2265_v14 = vld [vmem:[#allocation8 + $0x58] sm:$0xff]  }
 0x151   :  { %v2633_v16 = vpop.f32.mrf.mxu0 }
 0x152   :  { %v536_v17 = vmax.f32 %v490_v15, 0.0  ;;  %v492_v55 = vadd.f32 %v2633_v16, %v191_v53  ;;  %v2266_v15 = vld [vmem:[#allocation8 + $0x50] sm:$0xff]   ;;  %v2267_v16 = vld [vmem:[#allocation8 + $0x48] sm:$0xff]  }
 0x153   :  { %v493_v18 = vpop.f32.mrf.mxu0  ;;  %v2300_v53 = vld [vmem:[#allocation11 + $0x84] ss:$8 sps:$4 sm:$0xff]  }
 0x154   :  { %v539_v19 = vpack.c.bf16 %v536_v17, %v536_v17  ;;  %v537_v57 = vmax.f32 %v492_v55, 0.0  ;;  %v1860_v17 = vld [vmem:[%s2733_s4 + $0x1] ss:$0 sm:$0xff] }
 0x155   :  { %v494_v20 = vpop.f32.mrf.mxu0  ;;  %v782_v55 = vld [vmem:[%s2737_s8] sm:$0x3] }
 0x156   :  { %2028 = vmatmul.mubr.bf16.vlgmr.msra.gmra.mxu1 %v539_v19  ;;  %v936_v58 = vpack.c.bf16 %v537_v57, %v537_v57  ;;  %v2268_v19 = vld [vmem:[#allocation8 + $0x40] sm:$0xff]   ;;  %v791_v57 = vrot.slane %v782_v55, %v2645_v50 }
 0x157   :  { %875 = vmatpush1.bf16.msra.mxu1 %v2237_v22  ;;  %906 = vmatprep.mubr.bf16.mxu1 %v2525_v61 }
 0x158   :  { %876 = vmatprep.subr.bf16.mxu1 %v2242_v24  ;;  %v2269_v24 = vld [vmem:[#allocation7 + $0xb8] sm:$0xff]  }
 0x15b   :  { %877 = vmatpush1.bf16.msra.mxu1 %v2240_v25 }
 0x15c   :  { %878 = vmatprep.subr.bf16.mxu1 %v2245_v26 }
 0x15f   :  { %879 = vmatpush1.bf16.msra.mxu1 %v2243_v27  ;;  %v2270_v27 = vld [vmem:[#allocation7 + $0xb0] sm:$0xff]  }
 0x160   :  { %880 = vmatprep.subr.bf16.mxu1 %v2248_v28  ;;  %v2271_v28 = vld [vmem:[#allocation7 + $0xa8] sm:$0xff]  }
 0x163   :  { %881 = vmatpush1.bf16.msra.mxu1 %v2246_v29  ;;  %v2272_v29 = vld [vmem:[#allocation7 + $0xa0] sm:$0xff]  }
 0x164   :  { %882 = vmatprep.subr.bf16.mxu1 %v2251_v30  ;;  %v2273_v30 = vld [vmem:[#allocation7 + $0x98] sm:$0xff]  }
 0x167   :  { %883 = vmatpush1.bf16.msra.mxu1 %v2249_v31  ;;  %v194_v31 = vsub.s32 2, %v2619_v5 }
 0x168   :  { %884 = vmatprep.subr.bf16.mxu1 %v2254_v32  ;;  %v2274_v32 = vld [vmem:[#allocation7 + $0x90] sm:$0xff]  }
 0x16b   :  { %885 = vmatpush1.bf16.msra.mxu1 %v2252_v33  ;;  %v195_v33 = vrot.slane %v2627_v9, %v194_v31  ;;  %v2277_v9 = vld [vmem:[#allocation11 + $0xf0] ss:$8 sps:$4 sm:$0xff]  }
 0x16c   :  { %886 = vmatprep.subr.bf16.mxu1 %v2257_v34  ;;  %v2275_v34 = vld [vmem:[#allocation7 + $0x88] sm:$0xff]   ;;  %v2306_v31 = vld [vmem:[#allocation8 + $0x90] sm:$0xff]  }
 0x16f   :  { %887 = vmatpush1.bf16.msra.mxu1 %v2255_v35  ;;  %v531_v35 = vadd.f32 %v2629_v10, %v195_v33  ;;  %v2285_v10 = vld [vmem:[#allocation11 + $0xd4] ss:$8 sps:$4 sm:$0xff]   ;;  %v1898_v33 = vld [vmem:[%s2733_s4 + $0x2] ss:$0 sm:$0xff] }
 0x170   :  { %888 = vmatprep.subr.bf16.mxu1 %v2260_v59 }
 0x173   :  { %889 = vmatpush1.bf16.msra.mxu1 %v2258_v60 }
 0x174   :  { %2071 = vmatprep.subr.bf16.mxu1 %v2523_v52 }
 0x216   :  { %v645_v37 = vpop.f32.mrf.mxu1 }
 0x217   :  { %v646_v38 = vadd.f32 %v1823_v36, %v645_v37  ;;  %v2276_v36 = vld [vmem:[#allocation7 + $0x80] sm:$0xff]   ;;  %v538_v37 = vmax.f32 %v531_v35, 0.0 }
 0x218   :  { %v2029_v39 = vpop.f32.mrf.mxu1  ;;  %v2308_v35 = vld [vmem:[#allocation8 + $0x80] sm:$0xff]  }
 0x219   :  { %v651_v40 = vmax.f32 %v646_v38, 0.0  ;;  %v1347_v5 = vpack.c.bf16 %v538_v37, %v538_v37  ;;  %v2279_v38 = vld [vmem:[#allocation11 + $0xf4] ss:$8 sps:$4 sm:$0xff]   ;;  %v2282_v39 = vld [vmem:[#allocation11 + $0xe4] ss:$8 sps:$4 sm:$0xff]  }
 0x21a   :  { %v648_v41 = vpop.f32.mrf.mxu1 }
 0x21b   :  { %v652_v43 = vpack.c.bf16 %v651_v40, %v651_v40  ;;  %v2280_v40 = vld [vmem:[#allocation11 + $0xe0] ss:$8 sps:$4 sm:$0xff]   ;;  %v2283_v41 = vld [vmem:[#allocation11 + $0xd0] ss:$8 sps:$4 sm:$0xff]  }
 0x21c   :  { %v2030_v44 = vpop.f32.mrf.mxu1 }
 0x21d   :  { %2048 = vmatmul.mubr.bf16.vlgmr.msra.gmra.mxu0 %v652_v43  ;;  %v2286_v43 = vld [vmem:[#allocation11 + $0xc0] ss:$8 sps:$4 sm:$0xff]   ;;  %v2291_v44 = vld [vmem:[#allocation11 + $0xb4] ss:$8 sps:$4 sm:$0xff]  }
 0x21e   :  { %2052 = vmatpush3.bf16.msra.mxu0 %v2229_v42  ;;  %2067 = vmatprep.mubr.msk.bf16.mxu0 %vm2524_vm0, %v2523_v52  ;;  %v2288_v42 = vld [vmem:[#allocation11 + $0xc4] ss:$8 sps:$4 sm:$0xff]  }
 0x21f   :  { %2053 = vmatprep.subr.bf16.mxu0 %v2523_v52 }
 0x222   :  { %2054 = vmatpush3.bf16.msra.mxu0 %v2230_v45  ;;  %v2289_v45 = vld [vmem:[#allocation11 + $0xb0] ss:$8 sps:$4 sm:$0xff]  }
 0x223   :  { %2055 = vmatprep.subr.bf16.mxu0 %v2523_v52 }
 0x226   :  { %2056 = vmatpush3.bf16.msra.mxu0 %v2231_v46  ;;  %v2294_v46 = vld [vmem:[#allocation11 + $0xa4] ss:$8 sps:$4 sm:$0xff]  }
 0x227   :  { %2057 = vmatprep.subr.bf16.mxu0 %v2523_v52 }
 0x22a   :  { %2058 = vmatpush3.bf16.msra.mxu0 %v2232_v48  ;;  %v2292_v48 = vld [vmem:[#allocation11 + $0xa0] ss:$8 sps:$4 sm:$0xff]  }
 0x22b   :  { %2059 = vmatprep.subr.bf16.mxu0 %v2523_v52 }
 0x22e   :  { %2060 = vmatpush3.bf16.msra.mxu0 %v2233_v49  ;;  %v2297_v49 = vld [vmem:[#allocation11 + $0x94] ss:$8 sps:$4 sm:$0xff]  }
 0x22f   :  { %2061 = vmatprep.subr.bf16.mxu0 %v2523_v52 }
 0x232   :  { %2062 = vmatpush3.bf16.msra.mxu0 %v2234_v51  ;;  %v2295_v51 = vld [vmem:[#allocation11 + $0x90] ss:$8 sps:$4 sm:$0xff]  }
 0x233   :  { %2063 = vmatprep.subr.bf16.mxu0 %v2523_v52 }
 0x236   :  { %2064 = vmatpush3.bf16.msra.mxu0 %v2235_v54  ;;  %v2298_v54 = vld [vmem:[#allocation11 + $0x80] ss:$8 sps:$4 sm:$0xff]  }
 0x237   :  { %2065 = vmatprep.subr.bf16.mxu0 %v2523_v52 }
 0x23a   :  { %2066 = vmatpush3.bf16.msra.mxu0 %v2236_v56  ;;  %v787_v56 = vrot.slane %v782_v55, %v2622_v7  ;;  %v2332_v55 = vld [vmem:[#allocation11 + $0x104] ss:$8 sps:$4 sm:$0xff]  }
 0x23b   :  { %1277 = vmatprep.subr.bf16.mxu0 %v2279_v38 }
 0x23d   :  { %2068 = vmatmul.mubr.bf16.vlgmr.msra.gmra.mxu0 %v936_v58 }
 0x23e   :  { %1309 = vmatprep.mubr.bf16.mxu0 %v2525_v61  ;;  %1278 = vmatpush1.bf16.msra.mxu0 %v2277_v9 }
 0x23f   :  { %1279 = vmatprep.subr.bf16.mxu0 %v2282_v39 }
 0x242   :  { %1280 = vmatpush1.bf16.msra.mxu0 %v2280_v40  ;;  %v2311_v40 = vld [vmem:[#allocation11 + $0x174] ss:$8 sps:$4 sm:$0xff]  }
 0x243   :  { %1281 = vmatprep.subr.bf16.mxu0 %v2285_v10  ;;  %v2309_v10 = vld [vmem:[#allocation11 + $0x170] ss:$8 sps:$4 sm:$0xff]  }
 0x246   :  { %1282 = vmatpush1.bf16.msra.mxu0 %v2283_v41  ;;  %v2314_v41 = vld [vmem:[#allocation11 + $0x164] ss:$8 sps:$4 sm:$0xff]  }
 0x247   :  { %1283 = vmatprep.subr.bf16.mxu0 %v2288_v42  ;;  %v2312_v42 = vld [vmem:[#allocation11 + $0x160] ss:$8 sps:$4 sm:$0xff]  }
 0x24a   :  { %1284 = vmatpush1.bf16.msra.mxu0 %v2286_v43  ;;  %v2317_v43 = vld [vmem:[#allocation11 + $0x154] ss:$8 sps:$4 sm:$0xff]  }
 0x24b   :  { %1285 = vmatprep.subr.bf16.mxu0 %v2291_v44  ;;  %v2315_v44 = vld [vmem:[#allocation11 + $0x150] ss:$8 sps:$4 sm:$0xff]  }
 0x24e   :  { %1286 = vmatpush1.bf16.msra.mxu0 %v2289_v45  ;;  %v2318_v45 = vld [vmem:[#allocation11 + $0x140] ss:$8 sps:$4 sm:$0xff]  }
 0x24f   :  { %1287 = vmatprep.subr.bf16.mxu0 %v2294_v46  ;;  %v2323_v46 = vld [vmem:[#allocation11 + $0x134] ss:$8 sps:$4 sm:$0xff]  }
 0x252   :  { %1288 = vmatpush1.bf16.msra.mxu0 %v2292_v48  ;;  %v2321_v48 = vld [vmem:[#allocation11 + $0x130] ss:$8 sps:$4 sm:$0xff]  }
 0x253   :  { %1289 = vmatprep.subr.bf16.mxu0 %v2297_v49  ;;  %v2326_v49 = vld [vmem:[#allocation11 + $0x124] ss:$8 sps:$4 sm:$0xff]  }
 0x256   :  { %1290 = vmatpush1.bf16.msra.mxu0 %v2295_v51  ;;  %v2324_v51 = vld [vmem:[#allocation11 + $0x120] ss:$8 sps:$4 sm:$0xff]  }
 0x257   :  { %1291 = vmatprep.subr.bf16.mxu0 %v2300_v53  ;;  %v2329_v53 = vld [vmem:[#allocation11 + $0x114] ss:$8 sps:$4 sm:$0xff]  }
 0x25a   :  { %1292 = vmatpush1.bf16.msra.mxu0 %v2298_v54  ;;  %v2327_v54 = vld [vmem:[#allocation11 + $0x110] ss:$8 sps:$4 sm:$0xff]  }
 0x25b   :  { %2111 = vmatprep.subr.bf16.mxu0 %v2523_v52 }
 0x2dd   :  { %v758_v63 = vpop.f32.mrf.mxu0 }
 0x2de   :  { %v759_v0 = vadd.f32 %v1832_v62, %v758_v63 }
 0x2df   :  { %v2049_v1 = vpop.f32.mrf.mxu0 }
 0x2e0   :  { %v764_v2 = vmax.f32 %v759_v0, 0.0 }
 0x2e1   :  { %v761_v3 = vpop.f32.mrf.mxu0 }
 0x2e2   :  { %v765_v6 = vpack.c.bf16 %v764_v2, %v764_v2 }
 0x2e3   :  { %v2050_v8 = vpop.f32.mrf.mxu0 }
 0x2e4   :  { %907 = vmatmul.mubr.bf16.vlgmr.msra.gmra.mxu1 %v765_v6  ;;  %v1869_v8 = vld [vmem:[#allocation10 + $0x1] ss:$0 sm:$0xff] }
 0x2e5   :  { %2072 = vmatpush3.bf16.msra.mxu1 %v2261_v4  ;;  %2087 = vmatprep.mubr.msk.bf16.mxu1 %vm2524_vm0, %v2523_v52 }
 0x2e6   :  { %2073 = vmatprep.subr.bf16.mxu1 %v2523_v52 }
 0x2e9   :  { %2074 = vmatpush3.bf16.msra.mxu1 %v2262_v11 }
 0x2ea   :  { %2075 = vmatprep.subr.bf16.mxu1 %v2523_v52 }
 0x2ed   :  { %2076 = vmatpush3.bf16.msra.mxu1 %v2263_v12 }
 0x2ee   :  { %2077 = vmatprep.subr.bf16.mxu1 %v2523_v52 }
 0x2f1   :  { %2078 = vmatpush3.bf16.msra.mxu1 %v2264_v13 }
 0x2f2   :  { %2079 = vmatprep.subr.bf16.mxu1 %v2523_v52 }
 0x2f5   :  { %2080 = vmatpush3.bf16.msra.mxu1 %v2265_v14 }
 0x2f6   :  { %2081 = vmatprep.subr.bf16.mxu1 %v2523_v52 }
 0x2f9   :  { %2082 = vmatpush3.bf16.msra.mxu1 %v2266_v15 }
 0x2fa   :  { %2083 = vmatprep.subr.bf16.mxu1 %v2523_v52 }
 0x2fd   :  { %v1044_v18 = vpop.f32.mrf.mxu0  ;;  %2084 = vmatpush3.bf16.msra.mxu1 %v2267_v16 }
 0x2fe   :  { %v1045_v20 = vadd.f32 %v1860_v17, %v1044_v18  ;;  %2085 = vmatprep.subr.bf16.mxu1 %v2523_v52 }
 0x2ff   :  { %v2069_v21 = vpop.f32.mrf.mxu0 }
 0x300   :  { %v1050_v22 = vmax.f32 %v1045_v20, 0.0  ;;  %v2695_v21 = vld [vmem:[#allocation2 + $0x8] sm:$0xff] }
 0x301   :  { %v1047_v23 = vpop.f32.mrf.mxu0  ;;  %2086 = vmatpush3.bf16.msra.mxu1 %v2268_v19  ;;  %v2301_v19 = vld [vmem:[#allocation8 + $0xb8] sm:$0xff]  }
 0x302   :  { %v1051_v25 = vpack.c.bf16 %v1050_v22, %v1050_v22  ;;  %2091 = vmatprep.subr.bf16.mxu1 %v2523_v52 }
 0x303   :  { %v2070_v26 = vpop.f32.mrf.mxu0 }
 0x304   :  { %2088 = vmatmul.mubr.bf16.vlgmr.msra.gmra.mxu1 %v1051_v25  ;;  %v2302_v26 = vld [vmem:[#allocation8 + $0xb0] sm:$0xff]  }
 0x305   :  { %2092 = vmatpush3.bf16.msra.mxu1 %v2269_v24  ;;  %2107 = vmatprep.mubr.msk.bf16.mxu1 %vm2524_vm0, %v2523_v52 }
 0x306   :  { %2093 = vmatprep.subr.bf16.mxu1 %v2523_v52 }
 0x309   :  { %2094 = vmatpush3.bf16.msra.mxu1 %v2270_v27 }
 0x30a   :  { %2095 = vmatprep.subr.bf16.mxu1 %v2523_v52 }
 0x30d   :  { %2096 = vmatpush3.bf16.msra.mxu1 %v2271_v28  ;;  %v2303_v28 = vld [vmem:[#allocation8 + $0xa8] sm:$0xff]  }
 0x30e   :  { %2097 = vmatprep.subr.bf16.mxu1 %v2523_v52 }
 0x311   :  { %2098 = vmatpush3.bf16.msra.mxu1 %v2272_v29  ;;  %v2304_v29 = vld [vmem:[#allocation8 + $0xa0] sm:$0xff]  }
 0x312   :  { %2099 = vmatprep.subr.bf16.mxu1 %v2523_v52 }
 0x315   :  { %2100 = vmatpush3.bf16.msra.mxu1 %v2273_v30  ;;  %v2305_v30 = vld [vmem:[#allocation8 + $0x98] sm:$0xff]  }
 0x316   :  { %2101 = vmatprep.subr.bf16.mxu1 %v2523_v52 }
 0x319   :  { %2102 = vmatpush3.bf16.msra.mxu1 %v2274_v32  ;;  %v2307_v32 = vld [vmem:[#allocation8 + $0x88] sm:$0xff]  }
 0x31a   :  { %2103 = vmatprep.subr.bf16.mxu1 %v2523_v52 }
 0x31d   :  { %2104 = vmatpush3.bf16.msra.mxu1 %v2275_v34 }
 0x31e   :  { %2105 = vmatprep.subr.bf16.mxu1 %v2523_v52 }
 0x321   :  { %2106 = vmatpush3.bf16.msra.mxu1 %v2276_v36 }
 0x322   :  { %1688 = vmatprep.subr.bf16.mxu1 %v2311_v40 }
 0x324   :  { %2108 = vmatmul.mubr.bf16.vlgmr.msra.gmra.mxu1 %v1347_v5 }
 0x325   :  { %1720 = vmatprep.mubr.bf16.mxu1 %v2525_v61  ;;  %1689 = vmatpush1.bf16.msra.mxu1 %v2309_v10 }
 0x326   :  { %1690 = vmatprep.subr.bf16.mxu1 %v2314_v41 }
 0x329   :  { %1691 = vmatpush1.bf16.msra.mxu1 %v2312_v42 }
 0x32a   :  { %1692 = vmatprep.subr.bf16.mxu1 %v2317_v43 }
 0x32d   :  { %1693 = vmatpush1.bf16.msra.mxu1 %v2315_v44 }
 0x3a4   :  { %v908_v58 = vpop.f32.mrf.mxu1 }
 0x3a5   :  { %v909_v59 = vadd.f32 %v908_v58, %v787_v56  ;;  %v2330_v56 = vld [vmem:[#allocation11 + $0x100] ss:$8 sps:$4 sm:$0xff]  }
 0x3a6   :  { %v910_v60 = vpop.f32.mrf.mxu1 }
 0x3a7   :  { %v1857_v61 = vmul.f32 -1.442695, %v909_v59  ;;  %v911_v62 = vadd.f32 %v910_v60, %v791_v57  ;;  %v1878_v57 = vld [vmem:[%s2737_s8 + $0x2] sm:$0x3] }
 0x3a8   :  { %v912_v63 = vpop.f32.mrf.mxu1  ;;  %v1190_v58 = vrot.slane %v1878_v57, %v2622_v7  ;;  %v1194_v59 = vrot.slane %v1878_v57, %v2645_v50 }
 0x3a9   :  { %2333 = vpow2.f32 %v1857_v61  ;;  %v1858_v0 = vmul.f32 -1.442695, %v911_v62 }
 0x3aa   :  { %v913_v1 = vpop.f32.mrf.mxu1 }
 0x3ab   :  { %2335 = vpow2.f32 %v1858_v0 }
 0x3b6   :  { %v2334_v2 = vpop.eup %2333 }
 0x3b7   :  { %v921_v3 = vadd.f32 1.0, %v2334_v2 }
 0x3b8   :  { %v2336_v4 = vpop.eup %2335 }
 0x3b9   :  { %2337 = vrcp.f32 %v921_v3  ;;  %v922_v6 = vadd.f32 1.0, %v2336_v4 }
 0x3bb   :  { %2339 = vrcp.f32 %v922_v6 }
 0x3c4   :  { %v1159_v11 = vpop.f32.mrf.mxu1 }
 0x3c5   :  { %v1160_v12 = vadd.f32 %v1869_v8, %v1159_v11 }
 0x3c6   :  { %v2689_v13 = vpop.eup %2337  ;;  %v2089_v14 = vpop.f32.mrf.mxu1 }
 0x3c7   :  { %v1165_v15 = vmax.f32 %v1160_v12, 0.0  ;;  %v927_v16 = vsub.f32 %v2689_v13, %v2595_v47  ;;  %v1907_v12 = vld [vmem:[#allocation10 + $0x2] ss:$0 sm:$0xff] }
 0x3c8   :  { %v2693_v17 = vpop.eup %2339  ;;  %v1162_v18 = vpop.f32.mrf.mxu1 }
 0x3c9   :  { %v1166_v20 = vpack.c.bf16 %v1165_v15, %v1165_v15  ;;  %v928_v22 = vsub.f32 %v2693_v17, %v2695_v21  ;;  %v929_v24 = vmul.f32 %v927_v16, %v927_v16 }
 0x3ca   :  { %v2090_v23 = vpop.f32.mrf.mxu1 }
 0x3cb   :  { %1310 = vmatmul.mubr.bf16.vlgmr.msra.gmra.mxu0 %v1166_v20  ;;  %v930_v25 = vmul.f32 %v928_v22, %v928_v22 }
 0x3cc   :  { %2112 = vmatpush3.bf16.msra.mxu0 %v2301_v19  ;;  %2127 = vmatprep.mubr.msk.bf16.mxu0 %vm2524_vm0, %v2523_v52 }
 0x3cd   :  { %2113 = vmatprep.subr.bf16.mxu0 %v2523_v52  ;;  %v931_v27 = vadd.f32 %v930_v25, %v929_v24 }
 0x3cf   :  { %932 = vadd.xlane.f32.xlu0 %v931_v27 }
 0x3d0   :  { %2114 = vmatpush3.bf16.msra.mxu0 %v2302_v26 }
 0x3d1   :  { %2115 = vmatprep.subr.bf16.mxu0 %v2523_v52 }
 0x3d4   :  { %2116 = vmatpush3.bf16.msra.mxu0 %v2303_v28 }
 0x3d5   :  { %2117 = vmatprep.subr.bf16.mxu0 %v2523_v52 }
 0x3d8   :  { %2118 = vmatpush3.bf16.msra.mxu0 %v2304_v29 }
 0x3d9   :  { %2119 = vmatprep.subr.bf16.mxu0 %v2523_v52 }
 0x3dc   :  { %2120 = vmatpush3.bf16.msra.mxu0 %v2305_v30  ;;  %v1916_v30 = vld [vmem:[%s2737_s8 + $0x4] sm:$0x3]  ;;  %s2526_s8 = smov [#allocation13]  }
 0x3dd   :  { %2121 = vmatprep.subr.bf16.mxu0 %v2523_v52  ;;  %s1763_s5 = sshll.u32 %s2526_s8, 4  ;;  %s1764_s5 = int_to_ptr.vmem [resolvable:$true] %s1763_s5 }
 0x3de   :  { %s2479_s11 = scalar_lea.vmem %s1764_s5, 256  ;;  %p2484_p3 = scmp.lt.s32.totalorder %s1764_s5, %s1764_s5 }
 0x3df   :  { %p2480_p2 = scmp.ne.s32.totalorder %s1764_s5, %s2479_s11  ;;  %p2485_p4 = scmp.lt.s32.totalorder %s2479_s11, %s2479_s11 }
 0x3e0   :  { %2122 = vmatpush3.bf16.msra.mxu0 %v2306_v31  ;;  %v1601_v31 = vrot.slane %v1916_v30, %v2622_v7  ;;  %v2358_v7 = vld [vmem:[#allocation2] sm:$0xff] }
 0x3e1   :  { %2123 = vmatprep.subr.bf16.mxu0 %v2523_v52  ;;  %p2486_p5 = por %p2485_p4, %p2484_p3 }
 0x3e3   :  { %p2487_p6 = pnand %p2486_p5, %p2480_p2 }
 0x3e4   :  { %v1455_v34 = vpop.f32.mrf.mxu1  ;;  %2124 = vmatpush3.bf16.msra.mxu0 %v2307_v32  ;;  %v1605_v32 = vrot.slane %v1916_v30, %v2645_v50 }
 0x3e5   :  { %v1456_v36 = vadd.f32 %v1898_v33, %v1455_v34  ;;  %2125 = vmatprep.subr.bf16.mxu0 %v2523_v52  ;;  %v2320_v52 = vld [vmem:[#allocation11 + $0x144] ss:$8 sps:$4 sm:$0xff]  }
 0x3e6   :  { %v2109_v37 = vpop.f32.mrf.mxu1  ;;  %1694 = vmatprep.subr.bf16.mxu1 %v2320_v52 }
 0x3e7   :  { %v1461_v5 = vmax.f32 %v1456_v36, 0.0  ;;  %1695 = vmatpush1.bf16.msra.mxu1 %v2318_v45 }
 0x3e8   :  { %v1458_v38 = vpop.f32.mrf.mxu1  ;;  %2126 = vmatpush3.bf16.msra.mxu0 %v2308_v35  ;;  %1696 = vmatprep.subr.bf16.mxu1 %v2323_v46 }
 0x3e9   :  { %v1462_v9 = vpack.c.bf16 %v1461_v5, %v1461_v5 }
 0x3ea   :  { %v2110_v39 = vpop.f32.mrf.mxu1 }
 0x3eb   :  { %2128 = vmatmul.mubr.bf16.vlgmr.msra.gmra.mxu0 %v1462_v9  ;;  %1697 = vmatpush1.bf16.msra.mxu1 %v2321_v48 }
 0x3ec   :  { %1698 = vmatprep.subr.bf16.mxu1 %v2326_v49 }
 0x3ef   :  { %1699 = vmatpush1.bf16.msra.mxu1 %v2324_v51 }
 0x3f0   :  { %1700 = vmatprep.subr.bf16.mxu1 %v2329_v53 }
 0x3f3   :  { %1701 = vmatpush1.bf16.msra.mxu1 %v2327_v54 }
 0x3f4   :  { %1702 = vmatprep.subr.bf16.mxu1 %v2332_v55 }
 0x3f7   :  { %1703 = vmatpush1.bf16.msra.mxu1 %v2330_v56 }
 0x458   :  { %v933_v46 = vpop.xlane.xlu0 %932 }
 0x48b   :  { %v1311_v60 = vpop.f32.mrf.mxu0 }
 0x48c   :  { %v1312_v61 = vadd.f32 %v1311_v60, %v1190_v58 }
 0x48d   :  { %v1313_v62 = vpop.f32.mrf.mxu0 }
 0x48e   :  { %v1895_v63 = vmul.f32 -1.442695, %v1312_v61  ;;  %v1314_v0 = vadd.f32 %v1313_v62, %v1194_v59 }
 0x48f   :  { %v1315_v1 = vpop.f32.mrf.mxu0 }
 0x490   :  { %2341 = vpow2.f32 %v1895_v63  ;;  %v1896_v2 = vmul.f32 -1.442695, %v1314_v0 }
 0x491   :  { %v1316_v3 = vpop.f32.mrf.mxu0 }
 0x492   :  { %2343 = vpow2.f32 %v1896_v2 }
 0x49d   :  { %v2342_v4 = vpop.eup %2341 }
 0x49e   :  { %v1324_v6 = vadd.f32 1.0, %v2342_v4 }
 0x49f   :  { %v2344_v8 = vpop.eup %2343 }
 0x4a0   :  { %2345 = vrcp.f32 %v1324_v6  ;;  %v1325_v11 = vadd.f32 1.0, %v2344_v8 }
 0x4a2   :  { %2347 = vrcp.f32 %v1325_v11 }
 0x4ab   :  { %v1570_v14 = vpop.f32.mrf.mxu0 }
 0x4ac   :  { %v1571_v15 = vadd.f32 %v1907_v12, %v1570_v14 }
 0x4ad   :  { %v2346_v16 = vpop.eup %2345  ;;  %v2129_v18 = vpop.f32.mrf.mxu0 }
 0x4ae   :  { %v1576_v19 = vmax.f32 %v1571_v15, 0.0  ;;  %v1330_v20 = vsub.f32 %v2346_v16, %v2595_v47 }
 0x4af   :  { %v2348_v22 = vpop.eup %2347  ;;  %v1573_v23 = vpop.f32.mrf.mxu0 }
 0x4b0   :  { %v1577_v24 = vpack.c.bf16 %v1576_v19, %v1576_v19  ;;  %v1331_v25 = vsub.f32 %v2348_v22, %v2695_v21  ;;  %v1332_v27 = vmul.f32 %v1330_v20, %v1330_v20 }
 0x4b1   :  { %v2130_v26 = vpop.f32.mrf.mxu0 }
 0x4b2   :  { %1721 = vmatmul.mubr.bf16.vlgmr.msra.gmra.mxu1 %v1577_v24  ;;  %v1333_v28 = vmul.f32 %v1331_v25, %v1331_v25 }
 0x4b4   :  { %v1334_v29 = vadd.f32 %v1333_v28, %v1332_v27 }
 0x4b6   :  { %1335 = vadd.xlane.f32.xlu0 %v1334_v29 }
 0x53f   :  { %v1336_v48 = vpop.xlane.xlu0 %1335 }
 0x540   :  { %vm1337_vm1 = vcmp.lt.f32.partialorder %v1336_v48, %v933_v46 }
 0x541   :  { %v1338_v51 = vsel %vm1337_vm1, %v1336_v48, %v933_v46  ;;  %v1343_v53 = vsel %vm1337_vm1, %v2346_v16, %v2689_v13  ;;  %v1344_v54 = vsel %vm1337_vm1, %v2348_v22, %v2693_v17 }
 0x572   :  { %v1722_v47 = vpop.f32.mrf.mxu1 }
 0x573   :  { %v1723_v33 = vadd.f32 %v1722_v47, %v1601_v31 }
 0x574   :  { %v1724_v34 = vpop.f32.mrf.mxu1 }
 0x575   :  { %v1933_v35 = vmul.f32 -1.442695, %v1723_v33  ;;  %v1725_v36 = vadd.f32 %v1724_v34, %v1605_v32 }
 0x576   :  { %v1726_v37 = vpop.f32.mrf.mxu1 }
 0x577   :  { %2349 = vpow2.f32 %v1933_v35  ;;  %v1934_v5 = vmul.f32 -1.442695, %v1725_v36 }
 0x578   :  { %v1727_v38 = vpop.f32.mrf.mxu1 }
 0x579   :  { %2351 = vpow2.f32 %v1934_v5 }
 0x584   :  { %v2350_v9 = vpop.eup %2349 }
 0x585   :  { %v1735_v39 = vadd.f32 1.0, %v2350_v9 }
 0x586   :  { %v2352_v40 = vpop.eup %2351 }
 0x587   :  { %2353 = vrcp.f32 %v1735_v39  ;;  %v1736_v10 = vadd.f32 1.0, %v2352_v40 }
 0x589   :  { %2355 = vrcp.f32 %v1736_v10 }
 0x594   :  { %v2354_v41 = vpop.eup %2353 }
 0x595   :  { %v1741_v42 = vsub.f32 %v2354_v41, %v2358_v7 }
 0x596   :  { %v2356_v50 = vpop.eup %2355 }
 0x597   :  { %v1742_v43 = vsub.f32 %v2356_v50, %v2695_v21  ;;  %v1743_v44 = vmul.f32 %v1741_v42, %v1741_v42 }
 0x599   :  { %v1744_v52 = vmul.f32 %v1742_v43, %v1742_v43 }
 0x59b   :  { %v1745_v45 = vadd.f32 %v1744_v52, %v1743_v44 }
 0x59d   :  { %1746 = vadd.xlane.f32.xlu1 %v1745_v45 }
 0x626   :  { %v1747_v49 = vpop.xlane.xlu1 %1746 }
 0x627   :  { %vm1748_vm2 = vcmp.lt.f32.partialorder %v1747_v49, %v1338_v51 }
 0x628   :  { %v1753_v55 = vsel %vm1748_vm2, %v2354_v41, %v1343_v53  ;;  %v1754_v56 = vsel %vm1748_vm2, %v2356_v50, %v1344_v54 }
 0x629   :  { %1755 = vst [vmem:[#allocation13] sm:$0xff] %v1753_v55  ;;  %1756 = vst [vmem:[#allocation13 + $0x8] sm:$0xff] %v1754_v56 }
 0x62a   :  { %2490 = shalt.err (!%p2487_p6)
}
 0x62b   :  { %1766 = dma.vmem_to_hbm [thread:$0]  %s1764_s5, 256, %s2738_s9, [#allocation4]  }
 0x62c   :  { %2507 = dma.done.wait [#allocation4], 256  }
 0x62d   :  { %2508 = vsyncadd [#allocation4], 4294967040 }
 0x62e   :  { %1770 = vsyncpa [#allocation3], 1 }
 0x62f   :  { %1771 = vsyncpa [#allocation6], 1 }
 0x630   :  { %1772 = vsyncpa [#allocation9], 1 }
 0x631   :  { %1773 = vsyncpa [#allocation12], 1 }
 0x632   :  { %1774 = vsyncpa [#allocation4], 1 }

</bundles_post_ra>
